<compile_context>
chip_gen: v7x
topology: tpu7x:2x2x1
jax: 0.10.0
libtpu: 0.0.40
codegen_flags: <defaults>
</compile_context>

<pallas_src>
import functools

import jax
import jax.numpy as jnp
from jax.experimental import pallas as pl
from jax.experimental.pallas import tpu as pltpu


def _aggregation_kernel(ff_ref, cf_ref, wff_ref, wg_ref, bd_ref, out_ref, *,
                        flat_conv):
    # ff_ref : (TN, I*D)        flattened, UN-padded features
    # cf_ref : (TN, I*D_)       flattened conv features
    # wff_ref: (I*D, 2*I*D_)    [ scat | tile(W1[:D]/I, (I, I)) ]
    #                           cols [0, I*D_)   -> zero-padded features
    #                           cols [I*D_, 2*I*D_) -> gate-1 logits, already
    #                           replicated over the point dim (mean fused in).
    # wg_ref : (I*D_, I*D_)     tile(W2/I, (I, I))  (gate-2 logits, replicated)
    # bd_ref : (1, I*D_)        tile(b1 - b2, (1, I))
    # out_ref: (TN, I*D_)       lane-dense output block
    ff = ff_ref[...]
    cf = cf_ref[...]

    # One matmul on ff gives both the padded-feature scatter and the (already
    # lane-replicated) gate-1 logits.  K=I*D, N=2*I*D_ -- fully lane-dense.
    r = jnp.dot(ff, wff_ref[...], preferred_element_type=jnp.float32)
    feat_sc = r[:, :flat_conv]          # (TN, I*D_)  exact 0/1 pass-through
    z1r = r[:, flat_conv:]              # (TN, I*D_)  tile(Z1 - b1, (1, I))

    # Gate-2 logits (replicated), mean fused into the weights.
    z2r = jnp.dot(cf, wg_ref[...], preferred_element_type=jnp.float32)

    # 2-way softmax == sigmoid of the logit difference (numerically stable,
    # built only from exp / abs / where / exact reciprocal).
    x = z1r - z2r + bd_ref[...]
    e = jnp.exp(-jnp.abs(x))
    inv = pl.reciprocal(1.0 + e, approx=False)   # exact; approx breaks 1e-5 tol
    gate = jnp.where(x >= 0.0, inv, e * inv)     # = M1, replicated over points

    # out = M1 * feat_pad + (1 - M1) * conv  ==  conv + M1 * (feat_pad - conv)
    out_ref[...] = (cf + gate * (feat_sc - cf)).astype(out_ref.dtype)


def _pick_tn(n):
    """Largest multiple-of-8 divisor of n, capped at 512 rows per step."""
    cap = min(n, 512)
    for cand in range(cap, 7, -1):
        if n % cand == 0 and cand % 8 == 0:
            return cand
    return n  # tiny batch: single full-extent block


def aggregation(feature_matrix_batch, conv_feature_matrix_batch, w1, b1, w2, b2,
                *, tn=None):
    N, I, D = feature_matrix_batch.shape
    N_, I_, D_ = conv_feature_matrix_batch.shape
    assert N == N_ and I == I_ and D_ >= D

    if tn is None:
        tn = _pick_tn(N)
    tn = min(tn, N)
    assert N % tn == 0, "batch must be divisible by the per-step tile tn"
    assert tn % 8 == 0 or tn == N, "tn must be a multiple of 8 (sublane tiling)"
    dtype = conv_feature_matrix_batch.dtype

    flat_f = I * D
    flat_c = I * D_

    # Metadata-only flattening: (N, I, C) -> (N, I*C). No HBM pad, no copy.
    ff = feature_matrix_batch.reshape(N, flat_f)
    cf = conv_feature_matrix_batch.reshape(N, flat_c)

    # Gate weights with (a) the mean over points fused in (rows tiled, /I) and
    # (b) the point-dim replication of the gate fused in (columns tiled).
    # Padded channels of the mean are exactly zero, so only w1[:D] matters.
    wf_rep = jnp.tile(w1[:D, :].astype(jnp.float32) / I, (I, I))  # (I*D,  I*D_)
    wg_rep = jnp.tile(w2.astype(jnp.float32) / I, (I, I))         # (I*D_, I*D_)

    # 0/1 scatter: flat lane i*D + c -> flat lane i*D_ + c (zeros at padding).
    rows = jax.lax.broadcasted_iota(jnp.int32, (flat_f, flat_c), 0)
    cols = jax.lax.broadcasted_iota(jnp.int32, (flat_f, flat_c), 1)
    scat = ((rows // D == cols // D_) & (rows % D == cols % D_)).astype(jnp.float32)

    # Fuse scatter + gate-1 weights into one ff-side matrix (one matmul, one
    # weight push, one lane-dense result).
    wff = jnp.concatenate([scat, wf_rep], axis=1)                 # (I*D, 2*I*D_)

    # Single fused bias (b1 - b2), replicated over the point dim.
    bd = jnp.tile((b1 - b2).reshape(1, D_).astype(jnp.float32), (1, I))

    kernel = functools.partial(_aggregation_kernel, flat_conv=flat_c)

    out_flat = pl.pallas_call(
        kernel,
        out_shape=jax.ShapeDtypeStruct((N, flat_c), dtype),
        grid_spec=pltpu.PrefetchScalarGridSpec(
            num_scalar_prefetch=0,
            grid=(N // tn,),
            in_specs=[
                pl.BlockSpec((tn, flat_f), lambda n: (n, 0)),        # feat (flat)
                pl.BlockSpec((tn, flat_c), lambda n: (n, 0)),        # conv (flat)
                pl.BlockSpec((flat_f, 2 * flat_c), lambda n: (0, 0)),  # fused W_ff
                pl.BlockSpec((flat_c, flat_c), lambda n: (0, 0)),    # fused W_g
                pl.BlockSpec((1, flat_c), lambda n: (0, 0)),         # fused bias
            ],
            out_specs=pl.BlockSpec((tn, flat_c), lambda n: (n, 0)),
        ),
        compiler_params=pltpu.CompilerParams(
            dimension_semantics=("parallel",)),
    )(ff, cf, wff, wg_rep, bd)

    return out_flat.reshape(N, I, D_)


def _reference(feat, conv, w1, b1, w2, b2):
    N, I, D = feat.shape
    D_ = conv.shape[2]
    aug = D_ - D
    if aug > 0:
        feat = jnp.pad(feat, ((0, 0), (0, 0), (0, aug)))
    s1 = jnp.mean(feat, axis=1)
    s2 = jnp.mean(conv, axis=1)
    z1 = s1 @ w1 + b1
    z2 = s2 @ w2 + b2
    m = jax.nn.softmax(jnp.stack((z1, z2), 0), axis=0)
    return m[0][:, None, :] * feat + m[1][:, None, :] * conv


if __name__ == "__main__":
    # (N, I, D) clusters of points; conv adds P = D_ - D channels.
    N, I, D = 256, 16, 8
    D_ = 16  # augmentation P = 8

    key = jax.random.PRNGKey(0)
    k1, k2, k3, k4, k5, k6 = jax.random.split(key, 6)

    feature_matrix_batch = jax.random.normal(k1, (N, I, D), dtype=jnp.float32)
    conv_feature_matrix_batch = jax.random.normal(k2, (N, I, D_), dtype=jnp.float32)

    # deterministic synthetic MLP params (single Linear D_ -> D_ each)
    w1 = jax.random.normal(k3, (D_, D_), dtype=jnp.float32) * 0.1
    b1 = jax.random.normal(k4, (D_,), dtype=jnp.float32) * 0.1
    w2 = jax.random.normal(k5, (D_, D_), dtype=jnp.float32) * 0.1
    b2 = jax.random.normal(k6, (D_,), dtype=jnp.float32) * 0.1

    # tn=128 -> grid=2: large MXU-filling tiles AND both v7x TensorCores busy.
    out = aggregation(feature_matrix_batch, conv_feature_matrix_batch,
                      w1, b1, w2, b2, tn=128)
    out = jax.block_until_ready(out)

    ref = _reference(feature_matrix_batch, conv_feature_matrix_batch, w1, b1, w2, b2)
    assert out.shape == (N, I, D_)
    err = float(jnp.max(jnp.abs(out - ref)))
    assert jnp.allclose(out, ref, atol=1e-5, rtol=1e-5), f"max abs err {err}"

    print("KERNEL_OK")
</pallas_src>

<mosaic_0001>
module attributes {stable_mosaic.version = 11 : i64} {
  func.func @_aggregation_kernel(%arg0: i32, %arg1: memref<128x128xf32, #tpu.memory_space<vmem>>, %arg2: memref<128x256xf32, #tpu.memory_space<vmem>>, %arg3: memref<128x512xf32, #tpu.memory_space<vmem>>, %arg4: memref<256x256xf32, #tpu.memory_space<vmem>>, %arg5: memref<1x256xf32, #tpu.memory_space<vmem>>, %arg6: memref<128x256xf32, #tpu.memory_space<vmem>>) attributes {dimension_semantics = [#tpu.dimension_semantics<parallel>], iteration_bounds = array<i64: 2>, scalar_prefetch = 0 : i64, scratch_operands = 0 : i64, tpu.core_type = #tpu.core_type<tc>, window_params = [{transform_indices = @transform_0, window_bounds = array<i64: 128, 128>}, {transform_indices = @transform_1, window_bounds = array<i64: 128, 256>}, {pipeline_mode = #tpu.pipeline_mode<synchronous>, transform_indices = @transform_2, window_bounds = array<i64: 128, 512>}, {pipeline_mode = #tpu.pipeline_mode<synchronous>, transform_indices = @transform_3, window_bounds = array<i64: 256, 256>}, {pipeline_mode = #tpu.pipeline_mode<synchronous>, transform_indices = @transform_4, window_bounds = array<i64: 1, 256>}, {transform_indices = @transform_5, window_bounds = array<i64: 128, 256>}]} {
    %c0 = arith.constant 0 : index
    %c0_0 = arith.constant 0 : index
    %0 = vector.load %arg1[%c0, %c0_0] : memref<128x128xf32, #tpu.memory_space<vmem>>, vector<128x128xf32>
    %c0_1 = arith.constant 0 : index
    %c0_2 = arith.constant 0 : index
    %1 = vector.load %arg2[%c0_1, %c0_2] : memref<128x256xf32, #tpu.memory_space<vmem>>, vector<128x256xf32>
    %c0_3 = arith.constant 0 : index
    %c0_4 = arith.constant 0 : index
    %2 = vector.load %arg3[%c0_3, %c0_4] : memref<128x512xf32, #tpu.memory_space<vmem>>, vector<128x512xf32>
    %cst = arith.constant dense<0.000000e+00> : vector<128x512xf32>
    %3 = tpu.matmul %0, %2, %cst {dimension_numbers = #tpu.dot_dimension_numbers<[1], [0], [0], [1], [0, 0, 1, 1], [], []>} : vector<128x128xf32>, vector<128x512xf32>, vector<128x512xf32> -> vector<128x512xf32>
    %4 = vector.extract_strided_slice %3 {offsets = [0, 0], sizes = [128, 256], strides = [1, 1]} : vector<128x512xf32> to vector<128x256xf32>
    %5 = vector.extract_strided_slice %3 {offsets = [0, 256], sizes = [128, 256], strides = [1, 1]} : vector<128x512xf32> to vector<128x256xf32>
    %c0_5 = arith.constant 0 : index
    %c0_6 = arith.constant 0 : index
    %6 = vector.load %arg4[%c0_5, %c0_6] : memref<256x256xf32, #tpu.memory_space<vmem>>, vector<256x256xf32>
    %cst_7 = arith.constant dense<0.000000e+00> : vector<128x256xf32>
    %7 = tpu.matmul %1, %6, %cst_7 {dimension_numbers = #tpu.dot_dimension_numbers<[1], [0], [0], [1], [0, 0, 1, 1], [], []>} : vector<128x256xf32>, vector<256x256xf32>, vector<128x256xf32> -> vector<128x256xf32>
    %8 = arith.subf %5, %7 : vector<128x256xf32>
    %c0_8 = arith.constant 0 : index
    %c0_9 = arith.constant 0 : index
    %9 = vector.load %arg5[%c0_8, %c0_9] : memref<1x256xf32, #tpu.memory_space<vmem>>, vector<1x256xf32>
    %10 = vector.broadcast %9 : vector<1x256xf32> to vector<128x256xf32>
    %11 = arith.addf %8, %10 : vector<128x256xf32>
    %12 = math.absf %11 : vector<128x256xf32>
    %cst_10 = arith.constant 0.000000e+00 : f32
    %13 = vector.broadcast %cst_10 : f32 to vector<128x256xf32>
    %14 = arith.subf %13, %12 : vector<128x256xf32>
    %15 = math.exp %14 : vector<128x256xf32>
    %cst_11 = arith.constant 1.000000e+00 : f32
    %16 = vector.broadcast %cst_11 : f32 to vector<128x256xf32>
    %17 = arith.addf %16, %15 : vector<128x256xf32>
    %18 = tpu.reciprocal %17 : vector<128x256xf32> -> vector<128x256xf32>
    %cst_12 = arith.constant 0.000000e+00 : f32
    %19 = vector.broadcast %cst_12 : f32 to vector<128x256xf32>
    %20 = arith.cmpf oge, %11, %19 : vector<128x256xf32>
    %21 = arith.mulf %15, %18 : vector<128x256xf32>
    %22 = arith.select %20, %18, %21 : vector<128x256xi1>, vector<128x256xf32>
    %23 = arith.subf %4, %1 : vector<128x256xf32>
    %24 = arith.mulf %22, %23 : vector<128x256xf32>
    %25 = arith.addf %1, %24 : vector<128x256xf32>
    %c0_13 = arith.constant 0 : index
    %c0_14 = arith.constant 0 : index
    %26 = vector.load %arg6[%c0_13, %c0_14] : memref<128x256xf32, #tpu.memory_space<vmem>>, vector<128x256xf32>
    tpu.vector_store %arg6[%c0_13, %c0_14], %25 {strides = array<i32>} : memref<128x256xf32, #tpu.memory_space<vmem>>, vector<128x256xf32>,
    return
  }
  func.func @transform_0(%arg0: i32) -> (i32, i32) {
    %c0_i32 = arith.constant 0 : i32
    %c0_i32_0 = arith.constant 0 : i32
    return %arg0, %c0_i32 : i32, i32
  }
  func.func @transform_1(%arg0: i32) -> (i32, i32) {
    %c0_i32 = arith.constant 0 : i32
    %c0_i32_0 = arith.constant 0 : i32
    return %arg0, %c0_i32 : i32, i32
  }
  func.func @transform_2(%arg0: i32) -> (i32, i32) {
    %c0_i32 = arith.constant 0 : i32
    %c0_i32_0 = arith.constant 0 : i32
    %c0_i32_1 = arith.constant 0 : i32
    return %c0_i32, %c0_i32_0 : i32, i32
  }
  func.func @transform_3(%arg0: i32) -> (i32, i32) {
    %c0_i32 = arith.constant 0 : i32
    %c0_i32_0 = arith.constant 0 : i32
    %c0_i32_1 = arith.constant 0 : i32
    return %c0_i32, %c0_i32_0 : i32, i32
  }
  func.func @transform_4(%arg0: i32) -> (i32, i32) {
    %c0_i32 = arith.constant 0 : i32
    %c0_i32_0 = arith.constant 0 : i32
    %c0_i32_1 = arith.constant 0 : i32
    return %c0_i32, %c0_i32_0 : i32, i32
  }
  func.func @transform_5(%arg0: i32) -> (i32, i32) {
    %c0_i32 = arith.constant 0 : i32
    %c0_i32_0 = arith.constant 0 : i32
    return %arg0, %c0_i32 : i32, i32
  }
}

</mosaic_0001>

<bundles_post_ra>
// kernel: tpu_custom_call.1
= control target key start
LH: loop header
LB: loop body
LE: loop exit
PB: predicated region body
PF: predicated region fallthrough
CT: control target
= control target key end

     0   :  { %s3371_s0 = inlined_call_operand.hbm [shape: f32[256,128], index: 0, kind: input, shape index: {}]   ;;  %s3372_s1 = inlined_call_operand.hbm [shape: f32[256,256], index: 1, kind: input, shape index: {}]   ;;  %s3373_s2 = inlined_call_operand.hbm [shape: f32[128,512], index: 2, kind: input, shape index: {}]   ;;  %s3374_s3 = inlined_call_operand.hbm [shape: f32[256,256], index: 3, kind: input, shape index: {}]   ;;  %s3375_s4 = inlined_call_operand.vmem [shape: f32[1,256], index: 4, kind: input, shape index: {}]   ;;  %s3376_s5 = inlined_call_operand.hbm [shape: f32[256,256], index: 5, kind: output, shape index: {}]  }
   0x1   :  { %3420 = sst [smem:[#allocation79_spill]] %s3371_s0 }
   0x2   :  { %3421 = sst [smem:[#allocation80_spill]] %s3373_s2 }
   0x3   :  { %3422 = sst [smem:[#allocation81_spill]] %s3374_s3 }
   0x4   :  { %10 = vsyncpa [#allocation3], 0 }
   0x5   :  { %12 = vsyncpa [#allocation3 + $0x1], 0 }
   0x6   :  { %13 = vsyncpa [#allocation6], 0 }
   0x7   :  { %15 = vsyncpa [#allocation6 + $0x1], 0 }
   0x8   :  { %16 = vsyncpa [#allocation9], 0 }
   0x9   :  { %17 = vsyncpa [#allocation4], 0 }
   0xa   :  { %19 = vsyncpa [#allocation4 + $0x1], 0  ;;  %s2250_s18 = smov 0   ;;  %s2252_s19 = smov 0  }
   0xb   :  { %s2254_s20 = smov 0   ;;  %s2256_s21 = smov 0  }
   0xc LB: > { %s2271_s22 = sadd.s32 4294967295, %s2204_s21   ;;  %s1597_s23 = sadd.s32 4294967294, %s2204_s21   ;;  %s2204_s21 = sphi %s2256_s21, %s3591_s21   ;;  %s2200_s20 = sphi %s2254_s20, %s3590_s20   ;;  %s2196_s19 = sphi %s2252_s19, %s3589_s19   ;;  %s2192_s18 = sphi %s2250_s18, %s3588_s18  }
   0xd   : > { %p45_p0 = scmp.ne.s32.totalorder %s2196_s19, %s2192_s18  ;;  %p3377_p1 = scmp.eq.s32.totalorder %s2271_s22, 0 }
   0xe   : > { %p164_p3 = scmp.eq.s32.totalorder %s1597_s23, 1  ;;  %p1598_p5 = scmp.ge.s32.totalorder %s2204_s21, 1 }
   0xf   : > { %p2280_p4 = por %p3377_p1, %p45_p0  ;;  %p171_p7 = scmp.lt.s32.totalorder %s2204_s21, 3 }
  0x10   : > { %p2285_p6 = por %p164_p3, %p45_p0  ;;  %s2206_s27 = smov [#allocation7]  }
  0x11   : > { %s3423_s24 = scalar_select %p2280_p4, 1, 0 }
  0x12   : > { %s3424_s25 = scalar_select %p2285_p6, 1, 0 }
  0x13   : > { %p2290_p8 = pnand %p1598_p5, %p171_p7  ;;  %s183_s28 = sshll.u32 %s2206_s27, 4  ;;  %s2294_s28 = int_to_ptr.vmem [resolvable:$true] %s183_s28 }
  0x14   : > { %s2207_s30 = smov [#allocation8]   ;;  %s3427_s2 = sld [smem:[#allocation80_spill]] }
  0x15   : > { %p1800_p9 = pneg %p2290_p8  ;;  %s196_s6 = sshll.u32 %s2207_s30, 4  ;;  %s2305_s6 = int_to_ptr.vmem [resolvable:$true] %s196_s6 }
  0x17   : > { %p2301_p11 = pnand %p1800_p9, %p3377_p1 }
  0x19   : > { %p2012_p13 = pneg %p2301_p11 }
  0x1a   : > { %s2010_s9 = scalar_lea.hbm %s3427_s2, 8192 }
  0x1b   : > { %p2011_p12 = scmp.ne.s32.totalorder %s3427_s2, %s2010_s9  ;;  %p2017_p5 = scmp.lt.u32.totalorder %s2010_s9, %s3427_s2 }
  0x1d   : > { %p2013_p0 = pnand %p2012_p13, %p2011_p12 }
  0x1f   : > { %p2014_p3 = pneg %p2013_p0 }
  0x21   : > { %p2019_p7 = pnand %p2017_p5, %p2014_p3 }
  0x23   : > { %2022 = shalt.err (!%p2019_p7)
}
  0x24   : > { %s2023_s14 = scalar_lea.vmem %s2294_s28, 8192  ;;  %p2031_p2 = scmp.lt.s32.totalorder %s2294_s28, %s2294_s28 }
  0x25   : > { %p2024_p9 = scmp.ne.s32.totalorder %s2294_s28, %s2023_s14  ;;  %p2032_p12 = scmp.lt.s32.totalorder %s2023_s14, %s2023_s14 }
  0x27   : > { %p2026_p10 = pnand %p2024_p9, %p2012_p13  ;;  %p2033_p0 = por %p2032_p12, %p2031_p2 }
  0x29   : > { %p2027_p1 = pneg %p2026_p10 }
  0x2b   : > { %p2034_p6 = pnand %p2033_p0, %p2027_p1 }
  0x2d   : > { %2037 = shalt.err (!%p2034_p6)
}
  0x2e   : > { %s2208_s15 = smov 512   ;;  %s2209_s16 = smov 32  }
  0x2f   : > { %1803 = dma.hbm_to_vmem [thread:$0]  (!%p2301_p11), %s3427_s2, 8192, %s2294_s28, [#allocation6], %s2208_s15, %s2208_s15, %s2209_s16  }
  0x30   : > { %s3428_s3 = sld [smem:[#allocation81_spill]] }
  0x36   : > { %s2038_s7 = scalar_lea.hbm %s3428_s3, 8192 }
  0x37   : > { %p2039_p2 = scmp.ne.s32.totalorder %s3428_s3, %s2038_s7  ;;  %p2045_p10 = scmp.lt.u32.totalorder %s2038_s7, %s3428_s3 }
  0x39   : > { %p2041_p1 = pnand %p2039_p2, %p2012_p13 }
  0x3b   : > { %p2042_p6 = pneg %p2041_p1 }
  0x3d   : > { %p2047_p3 = pnand %p2045_p10, %p2042_p6 }
  0x3f   : > { %2050 = shalt.err (!%p2047_p3)
}
  0x40   : > { %s2051_s28 = scalar_lea.vmem %s2305_s6, 8192  ;;  %p2059_p12 = scmp.lt.s32.totalorder %s2305_s6, %s2305_s6 }
  0x41   : > { %p2052_p5 = scmp.ne.s32.totalorder %s2305_s6, %s2051_s28  ;;  %p2060_p0 = scmp.lt.s32.totalorder %s2051_s28, %s2051_s28 }
  0x43   : > { %p2054_p7 = pnand %p2052_p5, %p2012_p13  ;;  %p2061_p2 = por %p2060_p0, %p2059_p12 }
  0x45   : > { %p2055_p9 = pneg %p2054_p7 }
  0x47   : > { %p2062_p1 = pnand %p2061_p2, %p2055_p9 }
  0x49   : > { %2065 = shalt.err (!%p2062_p1)
}
  0x4a   : > { %s3378_s12 = smov 256   ;;  %s3381_s13 = smov 16  }
  0x4b   : > { %1806 = dma.hbm_to_vmem [thread:$0]  (!%p2301_p11), %s3428_s3, 8192, %s2305_s6, [#allocation9], %s3378_s12, %s3378_s12, %s3381_s13  }
  0x4c   : > { %s2363_s16 = sadd.s32 1, %s2204_s21   ;;  %s32_s23 = sadd.s32 1, %s2200_s20 }
  0x4d   : > { %s29_s17 = ssub.s32 %s2204_s21, %s2363_s16  ;;  %p39_p6 = scmp.ne.s32.totalorder %s2200_s20, %s2196_s19 }
  0x4e   : > { %p30_p13 = scmp.eq.s32.totalorder %s29_s17, 0  ;;  %p40_p10 = scmp.eq.s32.totalorder %s2204_s21, 0 }
  0x4f   : > { %p3429_p5 = scmp.eq.s32.totalorder %s2271_s22, 1  ;;  %p1820_p9 = scmp.lt.s32.totalorder %s2204_s21, 2 }
  0x50   : > { %s2372_s27 = scalar_select %p30_p13, %s2200_s20, %s32_s23  }
  0x51   : > { %p41_p3 = por %p40_p10, %p39_p6  ;;  %p2376_p7 = por %p3429_p5, %p39_p6 }
  0x52   : > { %s2382_s30 = sand.u32 1, %s2200_s20   ;;  %s1621_s7 = sshll.u32 %s2204_s21, 11 }
  0x53   : > { %s3430_s29 = scalar_select %p2376_p7, 1, 0 }
  0x54   : > { %s1602_s6 = sshll.u32 %s2382_s30, 7  ;;  %s3431_s0 = sld [smem:[#allocation79_spill]] }
  0x55   : > { %s217_s11 = scalar_lea.vmem [#allocation2], %s1602_s6  ;;  %p2393_p11 = pnand %p1820_p9, %p41_p3 }
  0x56   : > { %s224_s28 = sshll.u32 %s217_s11, 4  ;;  %s214_s17 = scalar_lea.sflag [#allocation3], %s2382_s30  ;;  %s2391_s28 = int_to_ptr.vmem [resolvable:$true] %s224_s28 }
  0x57   : > { %p2068_p0 = pneg %p2393_p11 }
  0x5a   : > { %s2389_s10 = scalar_lea.hbm %s3431_s0, %s1621_s7  ;;  %s2071_s8 = scalar_lea.hbm %s3431_s0, 4096 }
  0x5b   : > { %s2066_s23 = scalar_lea.hbm %s2389_s10, 2048  ;;  %p2072_p13 = scmp.lt.u32.totalorder %s2389_s10, %s3431_s0 }
  0x5c   : > { %p2067_p12 = scmp.ne.s32.totalorder %s2389_s10, %s2066_s23  ;;  %p2073_p6 = scmp.lt.u32.totalorder %s2071_s8, %s2066_s23 }
  0x5d   : > { %p2075_p3 = scmp.lt.u32.totalorder %s2066_s23, %s2389_s10 }
  0x5e   : > { %p2069_p2 = pnand %p2068_p0, %p2067_p12  ;;  %p2074_p10 = por %p2073_p6, %p2072_p13 }
  0x60   : > { %p2070_p1 = pneg %p2069_p2  ;;  %p2076_p5 = por %p2075_p3, %p2074_p10 }
  0x62   : > { %p2077_p9 = pnand %p2076_p5, %p2070_p1 }
  0x64   : > { %2080 = shalt.err (!%p2077_p9)
}
  0x65   : > { %s2081_s12 = scalar_lea.vmem %s2391_s28, 2048  ;;  %s2212_s6 = smov [#allocation2]  }
  0x66   : > { %p2082_p12 = scmp.ne.s32.totalorder %s2391_s28, %s2081_s12  ;;  %s2086_s7 = sshll.u32 %s2212_s6, 4  ;;  %s2087_s7 = int_to_ptr.vmem [resolvable:$false] %s2086_s7 }
  0x67   : > { %s2088_s9 = scalar_lea.vmem %s2087_s7, 4096  ;;  %p2089_p4 = scmp.lt.s32.totalorder %s2391_s28, %s2087_s7 }
  0x68   : > { %p2084_p2 = pnand %p2082_p12, %p2068_p0  ;;  %p2090_p13 = scmp.lt.s32.totalorder %s2088_s9, %s2081_s12 }
  0x6a   : > { %p2085_p7 = pneg %p2084_p2  ;;  %p2091_p6 = por %p2090_p13, %p2089_p4 }
  0x6c   : > { %p2092_p10 = pnand %p2091_p6, %p2085_p7 }
  0x6e   : > { %2095 = shalt.err (!%p2092_p10)
}
  0x6f   : > { %s2213_s23 = smov 128   ;;  %s2214_s8 = smov 8  }
  0x70   : > { %1810 = dma.hbm_to_vmem [thread:$0]  (!%p2393_p11), %s2389_s10, 2048, %s2391_s28, %s214_s17, %s2213_s23, %s2213_s23, %s2214_s8  }
  0x71   : > { %s1605_s11 = sshll.u32 %s2382_s30, 8  ;;  %s1623_s6 = sshll.u32 %s2204_s21, 12 }
  0x72   : > { %s2431_s9 = scalar_lea.hbm %s3372_s1, %s1623_s6  ;;  %s238_s13 = scalar_lea.vmem [#allocation5], %s1605_s11 }
  0x73   : > { %s246_s15 = sshll.u32 %s238_s13, 4  ;;  %s3433_s0 = sand.u32 1, %s2204_s21   ;;  %s2433_s15 = int_to_ptr.vmem [resolvable:$true] %s246_s15 }
  0x74   : > { %s2437_s2 = scalar_lea.sflag [#allocation6], %s3433_s0  ;;  %s2096_s3 = scalar_lea.hbm %s2431_s9, 4096 }
  0x75   : > { %p2097_p4 = scmp.ne.s32.totalorder %s2431_s9, %s2096_s3  ;;  %s2101_s28 = scalar_lea.hbm %s3372_s1, 8192 }
  0x76   : > { %p2102_p3 = scmp.lt.u32.totalorder %s2431_s9, %s3372_s1  ;;  %p2103_p5 = scmp.lt.u32.totalorder %s2101_s28, %s2096_s3 }
  0x77   : > { %p2099_p7 = pnand %p2097_p4, %p2068_p0  ;;  %p2105_p12 = scmp.lt.u32.totalorder %s2096_s3, %s2431_s9 }
  0x78   : > { %p2104_p9 = por %p2103_p5, %p2102_p3 }
  0x79   : > { %p2100_p1 = pneg %p2099_p7 }
  0x7a   : > { %p2106_p2 = por %p2105_p12, %p2104_p9 }
  0x7c   : > { %p2107_p13 = pnand %p2106_p2, %p2100_p1 }
  0x7e   : > { %2110 = shalt.err (!%p2107_p13)
}
  0x7f   : > { %s2111_s0 = scalar_lea.vmem %s2433_s15, 4096  ;;  %s2215_s13 = smov [#allocation5]  }
  0x80   : > { %p2112_p6 = scmp.ne.s32.totalorder %s2433_s15, %s2111_s0  ;;  %s2116_s8 = sshll.u32 %s2215_s13, 4  ;;  %s2117_s8 = int_to_ptr.vmem [resolvable:$false] %s2116_s8 }
  0x81   : > { %s2118_s11 = scalar_lea.vmem %s2117_s8, 8192  ;;  %p2119_p7 = scmp.lt.s32.totalorder %s2433_s15, %s2117_s8 }
  0x82   : > { %p2114_p10 = pnand %p2112_p6, %p2068_p0  ;;  %p2120_p3 = scmp.lt.s32.totalorder %s2118_s11, %s2111_s0 }
  0x84   : > { %p2115_p4 = pneg %p2114_p10  ;;  %p2121_p5 = por %p2120_p3, %p2119_p7 }
  0x86   : > { %p2122_p9 = pnand %p2121_p5, %p2115_p4 }
  0x88   : > { %2125 = shalt.err (!%p2122_p9)
}
  0x89   : > { %s3434_s3 = smov 16   ;;  %s3435_s6 = smov 256  }
  0x8a   : > { %1813 = dma.hbm_to_vmem [thread:$0]  (!%p2393_p11), %s2431_s9, 4096, %s2433_s15, %s2437_s2, %s3435_s6, %s3435_s6, %s3434_s3  }
  0x8b   : > { %258 = sbr.rel (%p2290_p8) target bundleno = 618 (0x26a), region = 40 }
  0x92   : > { %s2469_s7 = sand.u32 1, %s2196_s19   ;;  %p3436_p0 = scmp.ne.s32.totalorder %s3423_s24, 0 }
  0x93   : > { %s1610_s12 = sshll.u32 %s2469_s7, 7  ;;  %s261_s30 = scalar_lea.sflag [#allocation3], %s2469_s7 }
  0x94   : > { %s2473_s10 = scalar_lea.vmem [#allocation2], %s1610_s12 }
  0x95   : > { %2171 = dma.done.wait (%p3436_p0), %s261_s30, 2048  }
  0x96   : > { %2173 = vsyncadd (%p3436_p0), %s261_s30, 4294965248  ;;  %s269_s2 = sand.u32 1, %s2271_s22   ;;  %s1611_s26 = sshll.u32 %s2469_s7, 8 }
  0x97   : > { %s270_s14 = scalar_lea.sflag [#allocation6], %s269_s2  ;;  %s2483_s15 = scalar_lea.vmem [#allocation5], %s1611_s26 }
  0x98   : > { %2175 = dma.done.wait (%p3436_p0), %s270_s14, 4096  }
  0x99   : > { %2177 = vsyncadd (%p3436_p0), %s270_s14, 4294963200  ;;  %p3437_p8 = scmp.eq.s32.totalorder %s2271_s22, 0 }
  0x9b   : > { %2179 = dma.done.wait (%p3437_p8), [#allocation6], 8192   ;;  %p3438_p11 = pmov %p3437_p8 }
  0x9c   : > { %p3439_p1 = pmov %p3437_p8 }
  0x9d   : > { %2181 = vsyncadd (%p3438_p11), [#allocation6], 4294959104 }
  0x9e   : > { %2183 = dma.done.wait (%p3439_p1), [#allocation9], 8192   ;;  %p3440_p12 = pmov %p3439_p1 }
  0x9f   : > { %v2216_v0 = vmov 0.0   ;;  %v365_v1 = vld [vmem:[#allocation7 + $0x8] sm:$0xff]  ;;  %v367_v3 = vld [vmem:[#allocation7 + $0x18] sm:$0xff]  ;;  %v364_v6 = vld [vmem:[#allocation7] sm:$0xff]  ;;  %s3001_s28 = scalar_lea.vmem [#allocation10], %s1611_s26  ;;  %s1625_s17 = sshll.u32 %s2271_s22, 12 }
  0xa0   : > { %2185 = vsyncadd (%p3440_p12), [#allocation9], 4294959104  ;;  %492 = vmatprep.mubr.f32.mxu0 %v2216_v0  ;;  %653 = vmatprep.mubr.f32.mxu1 %v2216_v0  ;;  %v369_v2 = vld [vmem:[#allocation7 + $0x28] sm:$0xff]  ;;  %v371_v5 = vld [vmem:[#allocation7 + $0x38] sm:$0xff]  ;;  %s1482_s23 = sshll.u32 %s3001_s28, 4  ;;  %s3323_s8 = scalar_lea.hbm %s3376_s5, %s1625_s17  ;;  %s3325_s23 = int_to_ptr.vmem [resolvable:$true] %s1482_s23 }
  0xa1   : > { %v1626_v4 = vpack.c.bf16 %v369_v2, %v365_v1  ;;  %v368_v7 = vld [vmem:[#allocation7 + $0x20] sm:$0xff]  ;;  %v1658_v8 = vpack.c.bf16 %v371_v5, %v367_v3  ;;  %v366_v10 = vld [vmem:[#allocation7 + $0x10] sm:$0xff]  ;;  %v373_v12 = vld [vmem:[#allocation7 + $0x48] sm:$0xff]  ;;  %s1468_s11 = scalar_lea.sflag [#allocation4], %s2469_s7  ;;  %s2126_s3 = scalar_lea.vmem %s3325_s23, 4096 }
  0xa2   : > { %v1628_v9 = vpack.c.bf16 %v368_v7, %v364_v6  ;;  %v370_v11 = vld [vmem:[#allocation7 + $0x30] sm:$0xff]  ;;  %v377_v14 = vld [vmem:[#allocation7 + $0x68] sm:$0xff]  ;;  %v375_v15 = vld [vmem:[#allocation7 + $0x58] sm:$0xff]  ;;  %p2127_p2 = scmp.ne.s32.totalorder %s3325_s23, %s2126_s3  ;;  %p3585_p13 = scmp.ne.s32.totalorder %s3430_s29, 0 }
  0xa3   : > { %1627 = vmatprep.subr.bf16.mxu0 %v1626_v4  ;;  %v1660_v13 = vpack.c.bf16 %v370_v11, %v366_v10  ;;  %v379_v16 = vld [vmem:[#allocation7 + $0x78] sm:$0xff]  ;;  %1659 = vmatprep.subr.bf16.mxu1 %v1658_v8  ;;  %v1630_v17 = vpack.c.bf16 %v377_v14, %v373_v12  ;;  %v372_v19 = vld [vmem:[#allocation7 + $0x40] sm:$0xff]  ;;  %v374_v21 = vld [vmem:[#allocation7 + $0x50] sm:$0xff]  ;;  %s2217_s22 = smov [#allocation10]  }
  0xa4   : > { %1629 = vmatpush1.bf16.msra.mxu0 %v1628_v9  ;;  %v1662_v18 = vpack.c.bf16 %v379_v16, %v375_v15  ;;  %v376_v20 = vld [vmem:[#allocation7 + $0x60] sm:$0xff]  ;;  %v378_v23 = vld [vmem:[#allocation7 + $0x70] sm:$0xff]  ;;  %v381_v24 = vld [vmem:[#allocation7 + $0x88] sm:$0xff]  ;;  %p2128_p6 = pnand %p2127_p2, %p3585_p13  ;;  %s2130_s6 = sshll.u32 %s2217_s22, 4  ;;  %s2131_s6 = int_to_ptr.vmem [resolvable:$false] %s2130_s6 }
  0xa5   : > { %1661 = vmatpush1.bf16.msra.mxu1 %v1660_v13  ;;  %v1632_v22 = vpack.c.bf16 %v376_v20, %v372_v19  ;;  %v385_v25 = vld [vmem:[#allocation7 + $0xa8] sm:$0xff]  ;;  %1631 = vmatprep.subr.bf16.mxu0 %v1630_v17  ;;  %v1664_v26 = vpack.c.bf16 %v378_v23, %v374_v21  ;;  %v383_v28 = vld [vmem:[#allocation7 + $0x98] sm:$0xff]  ;;  %v380_v30 = vld [vmem:[#allocation7 + $0x80] sm:$0xff]  ;;  %s2132_s12 = scalar_lea.vmem %s2131_s6, 8192  ;;  %p2133_p4 = scmp.lt.s32.totalorder %s3325_s23, %s2131_s6 }
  0xa6   : > { %1663 = vmatprep.subr.bf16.mxu1 %v1662_v18  ;;  %v1634_v27 = vpack.c.bf16 %v385_v25, %v381_v24  ;;  %v387_v29 = vld [vmem:[#allocation7 + $0xb8] sm:$0xff]  ;;  %v384_v32 = vld [vmem:[#allocation7 + $0xa0] sm:$0xff]  ;;  %v382_v33 = vld [vmem:[#allocation7 + $0x90] sm:$0xff]  ;;  %p2129_p10 = pneg %p2128_p6  ;;  %p2134_p7 = scmp.lt.s32.totalorder %s2132_s12, %s2126_s3 }
  0xa7   : > { %v1666_v31 = vpack.c.bf16 %v387_v29, %v383_v28  ;;  %v386_v34 = vld [vmem:[#allocation7 + $0xb0] sm:$0xff]  ;;  %v1636_v35 = vpack.c.bf16 %v384_v32, %v380_v30  ;;  %v389_v36 = vld [vmem:[#allocation7 + $0xc8] sm:$0xff]  ;;  %v391_v38 = vld [vmem:[#allocation7 + $0xd8] sm:$0xff] }
  0xa8   : > { %1633 = vmatpush1.bf16.msra.mxu0 %v1632_v22  ;;  %v393_v37 = vld [vmem:[#allocation7 + $0xe8] sm:$0xff]  ;;  %v1668_v39 = vpack.c.bf16 %v386_v34, %v382_v33  ;;  %v395_v41 = vld [vmem:[#allocation7 + $0xf8] sm:$0xff]  ;;  %v388_v42 = vld [vmem:[#allocation7 + $0xc0] sm:$0xff]  ;;  %p2135_p3 = por %p2134_p7, %p2133_p4 }
  0xa9   : > { %1665 = vmatpush1.bf16.msra.mxu1 %v1664_v26  ;;  %1635 = vmatprep.subr.bf16.mxu0 %v1634_v27  ;;  %v1638_v40 = vpack.c.bf16 %v393_v37, %v389_v36  ;;  %v392_v43 = vld [vmem:[#allocation7 + $0xe0] sm:$0xff]  ;;  %v1670_v44 = vpack.c.bf16 %v395_v41, %v391_v38  ;;  %v390_v45 = vld [vmem:[#allocation7 + $0xd0] sm:$0xff]  ;;  %v397_v47 = vld [vmem:[#allocation7 + $0x108] sm:$0xff] }
  0xaa   : > { %1667 = vmatprep.subr.bf16.mxu1 %v1666_v31  ;;  %v394_v46 = vld [vmem:[#allocation7 + $0xf0] sm:$0xff]  ;;  %v401_v48 = vld [vmem:[#allocation7 + $0x128] sm:$0xff]  ;;  %v399_v49 = vld [vmem:[#allocation7 + $0x118] sm:$0xff]  ;;  %v1640_v51 = vpack.c.bf16 %v392_v43, %v388_v42  ;;  %p2136_p5 = pnand %p2135_p3, %p2129_p10 }
  0xab   : > { %v403_v50 = vld [vmem:[#allocation7 + $0x138] sm:$0xff]  ;;  %v1672_v52 = vpack.c.bf16 %v394_v46, %v390_v45  ;;  %v1642_v53 = vpack.c.bf16 %v401_v48, %v397_v47  ;;  %v396_v54 = vld [vmem:[#allocation7 + $0x100] sm:$0xff]  ;;  %v398_v56 = vld [vmem:[#allocation7 + $0x110] sm:$0xff] }
  0xac   : > { %1637 = vmatpush1.bf16.msra.mxu0 %v1636_v35  ;;  %v400_v55 = vld [vmem:[#allocation7 + $0x120] sm:$0xff]  ;;  %v1674_v57 = vpack.c.bf16 %v403_v50, %v399_v49  ;;  %v402_v58 = vld [vmem:[#allocation7 + $0x130] sm:$0xff]  ;;  %v405_v59 = vld [vmem:[#allocation7 + $0x148] sm:$0xff] }
  0xad   : > { %1669 = vmatpush1.bf16.msra.mxu1 %v1668_v39  ;;  %1639 = vmatprep.subr.bf16.mxu0 %v1638_v40  ;;  %v409_v60 = vld [vmem:[#allocation7 + $0x168] sm:$0xff]  ;;  %v407_v61 = vld [vmem:[#allocation7 + $0x158] sm:$0xff]  ;;  %v1644_v63 = vpack.c.bf16 %v400_v55, %v396_v54  ;;  %v1676_v1 = vpack.c.bf16 %v402_v58, %v398_v56  ;;  %v404_v3 = vld [vmem:[#allocation7 + $0x140] sm:$0xff] }
  0xae   : > { %1671 = vmatprep.subr.bf16.mxu1 %v1670_v44  ;;  %v411_v62 = vld [vmem:[#allocation7 + $0x178] sm:$0xff]  ;;  %v1646_v2 = vpack.c.bf16 %v409_v60, %v405_v59  ;;  %v408_v4 = vld [vmem:[#allocation7 + $0x160] sm:$0xff]  ;;  %v406_v5 = vld [vmem:[#allocation7 + $0x150] sm:$0xff] }
  0xaf   : > { %v1678_v6 = vpack.c.bf16 %v411_v62, %v407_v61  ;;  %v410_v7 = vld [vmem:[#allocation7 + $0x170] sm:$0xff]  ;;  %v413_v8 = vld [vmem:[#allocation7 + $0x188] sm:$0xff]  ;;  %v415_v10 = vld [vmem:[#allocation7 + $0x198] sm:$0xff]  ;;  %v1648_v12 = vpack.c.bf16 %v408_v4, %v404_v3 }
  0xb0   : > { %1641 = vmatpush1.bf16.msra.mxu0 %v1640_v51  ;;  %v417_v9 = vld [vmem:[#allocation7 + $0x1a8] sm:$0xff]  ;;  %v419_v11 = vld [vmem:[#allocation7 + $0x1b8] sm:$0xff]  ;;  %v1680_v13 = vpack.c.bf16 %v410_v7, %v406_v5  ;;  %v412_v15 = vld [vmem:[#allocation7 + $0x180] sm:$0xff] }
  0xb1   : > { %1673 = vmatpush1.bf16.msra.mxu1 %v1672_v52  ;;  %1643 = vmatprep.subr.bf16.mxu0 %v1642_v53  ;;  %v1650_v14 = vpack.c.bf16 %v417_v9, %v413_v8  ;;  %v416_v16 = vld [vmem:[#allocation7 + $0x1a0] sm:$0xff]  ;;  %v414_v17 = vld [vmem:[#allocation7 + $0x190] sm:$0xff]  ;;  %v1682_v18 = vpack.c.bf16 %v419_v11, %v415_v10  ;;  %v421_v20 = vld [vmem:[#allocation7 + $0x1c8] sm:$0xff] }
  0xb2   : > { %1675 = vmatprep.subr.bf16.mxu1 %v1674_v57  ;;  %v418_v19 = vld [vmem:[#allocation7 + $0x1b0] sm:$0xff]  ;;  %v425_v21 = vld [vmem:[#allocation7 + $0x1e8] sm:$0xff]  ;;  %v423_v22 = vld [vmem:[#allocation7 + $0x1d8] sm:$0xff]  ;;  %v1652_v24 = vpack.c.bf16 %v416_v16, %v412_v15 }
  0xb3   : > { %v427_v23 = vld [vmem:[#allocation7 + $0x1f8] sm:$0xff]  ;;  %v1684_v25 = vpack.c.bf16 %v418_v19, %v414_v17  ;;  %v1654_v26 = vpack.c.bf16 %v425_v21, %v421_v20  ;;  %v420_v27 = vld [vmem:[#allocation7 + $0x1c0] sm:$0xff]  ;;  %v422_v29 = vld [vmem:[#allocation7 + $0x1d0] sm:$0xff] }
  0xb4   : > { %1645 = vmatpush1.bf16.msra.mxu0 %v1644_v63  ;;  %v424_v28 = vld [vmem:[#allocation7 + $0x1e0] sm:$0xff]  ;;  %v1686_v30 = vpack.c.bf16 %v427_v23, %v423_v22  ;;  %v426_v31 = vld [vmem:[#allocation7 + $0x1f0] sm:$0xff]  ;;  %v751_v32 = vld [vmem:[#allocation8 + $0x8] sm:$0xff] }
  0xb5   : > { %1677 = vmatpush1.bf16.msra.mxu1 %v1676_v1  ;;  %1647 = vmatprep.subr.bf16.mxu0 %v1646_v2  ;;  %v753_v33 = vld [vmem:[#allocation8 + $0x18] sm:$0xff]  ;;  %v1656_v34 = vpack.c.bf16 %v424_v28, %v420_v27  ;;  %v1688_v35 = vpack.c.bf16 %v426_v31, %v422_v29  ;;  %v750_v37 = vld [vmem:[#allocation8] sm:$0xff]  ;;  %v752_v38 = vld [vmem:[#allocation8 + $0x10] sm:$0xff] }
  0xb6   : > { %1679 = vmatprep.subr.bf16.mxu1 %v1678_v6  ;;  %v1690_v36 = vpack.c.bf16 %v753_v33, %v751_v32  ;;  %v755_v39 = vld [vmem:[#allocation8 + $0x28] sm:$0xff]  ;;  %v757_v40 = vld [vmem:[#allocation8 + $0x38] sm:$0xff]  ;;  %v316_v41 = vld [vmem:[%s2473_s10] sm:$0xff]  ;;  %v1692_v42 = vpack.c.bf16 %v752_v38, %v750_v37 }
  0xb7   : > { %v754_v43 = vld [vmem:[#allocation8 + $0x20] sm:$0xff]  ;;  %v756_v44 = vld [vmem:[#allocation8 + $0x30] sm:$0xff]  ;;  %v1694_v45 = vpack.c.bf16 %v757_v40, %v755_v39  ;;  %v759_v46 = vld [vmem:[#allocation8 + $0x48] sm:$0xff] }
  0xb8   : > { %1649 = vmatpush1.bf16.msra.mxu0 %v1648_v12  ;;  %v761_v47 = vld [vmem:[#allocation8 + $0x58] sm:$0xff]  ;;  %v317_v48 = vld [vmem:[%s2473_s10 + $0x8] sm:$0xff]  ;;  %v1696_v49 = vpack.c.bf16 %v756_v44, %v754_v43  ;;  %v758_v50 = vld [vmem:[#allocation8 + $0x40] sm:$0xff] }
  0xb9   : > { %1681 = vmatpush1.bf16.msra.mxu1 %v1680_v13  ;;  %1651 = vmatprep.subr.bf16.mxu0 %v1650_v14  ;;  %v760_v51 = vld [vmem:[#allocation8 + $0x50] sm:$0xff]  ;;  %v1698_v52 = vpack.c.bf16 %v761_v47, %v759_v46  ;;  %v763_v53 = vld [vmem:[#allocation8 + $0x68] sm:$0xff]  ;;  %v765_v54 = vld [vmem:[#allocation8 + $0x78] sm:$0xff] }
  0xba   : > { %1683 = vmatprep.subr.bf16.mxu1 %v1682_v18  ;;  %v318_v55 = vld [vmem:[%s2473_s10 + $0x10] sm:$0xff]  ;;  %v1700_v56 = vpack.c.bf16 %v760_v51, %v758_v50  ;;  %v762_v57 = vld [vmem:[#allocation8 + $0x60] sm:$0xff]  ;;  %v1702_v59 = vpack.c.bf16 %v765_v54, %v763_v53  ;;  %v767_v60 = vld [vmem:[#allocation8 + $0x88] sm:$0xff] }
  0xbb   : > { %v764_v58 = vld [vmem:[#allocation8 + $0x70] sm:$0xff]  ;;  %v769_v61 = vld [vmem:[#allocation8 + $0x98] sm:$0xff]  ;;  %v766_v1 = vld [vmem:[#allocation8 + $0x80] sm:$0xff] }
  0xbc   : > { %1653 = vmatpush1.bf16.msra.mxu0 %v1652_v24  ;;  %v319_v62 = vld [vmem:[%s2473_s10 + $0x18] sm:$0xff]  ;;  %v1704_v63 = vpack.c.bf16 %v764_v58, %v762_v57  ;;  %v768_v2 = vld [vmem:[#allocation8 + $0x90] sm:$0xff]  ;;  %v1706_v3 = vpack.c.bf16 %v769_v61, %v767_v60  ;;  %v771_v4 = vld [vmem:[#allocation8 + $0xa8] sm:$0xff] }
  0xbd   : > { %1685 = vmatpush1.bf16.msra.mxu1 %v1684_v25  ;;  %1655 = vmatprep.subr.bf16.mxu0 %v1654_v26  ;;  %v773_v5 = vld [vmem:[#allocation8 + $0xb8] sm:$0xff]  ;;  %v320_v6 = vld [vmem:[%s2473_s10 + $0x20] sm:$0xff]  ;;  %v1708_v7 = vpack.c.bf16 %v768_v2, %v766_v1  ;;  %v772_v9 = vld [vmem:[#allocation8 + $0xb0] sm:$0xff] }
  0xbe   : > { %1687 = vmatprep.subr.bf16.mxu1 %v1686_v30  ;;  %v770_v8 = vld [vmem:[#allocation8 + $0xa0] sm:$0xff]  ;;  %v1710_v10 = vpack.c.bf16 %v773_v5, %v771_v4  ;;  %v775_v11 = vld [vmem:[#allocation8 + $0xc8] sm:$0xff]  ;;  %v777_v12 = vld [vmem:[#allocation8 + $0xd8] sm:$0xff] }
  0xbf   : > { %v321_v13 = vld [vmem:[%s2473_s10 + $0x28] sm:$0xff]  ;;  %v1712_v14 = vpack.c.bf16 %v772_v9, %v770_v8  ;;  %v774_v15 = vld [vmem:[#allocation8 + $0xc0] sm:$0xff]  ;;  %v776_v16 = vld [vmem:[#allocation8 + $0xd0] sm:$0xff]  ;;  %v1714_v17 = vpack.c.bf16 %v777_v12, %v775_v11 }
  0xc0   : > { %1657 = vmatpush1.bf16.msra.mxu0 %v1656_v34  ;;  %v779_v18 = vld [vmem:[#allocation8 + $0xe8] sm:$0xff]  ;;  %v781_v19 = vld [vmem:[#allocation8 + $0xf8] sm:$0xff]  ;;  %v322_v20 = vld [vmem:[%s2473_s10 + $0x30] sm:$0xff]  ;;  %v1716_v21 = vpack.c.bf16 %v776_v16, %v774_v15 }
  0xc1   : > { %1689 = vmatpush1.bf16.msra.mxu1 %v1688_v35  ;;  %1691 = vmatprep.subr.bf16.mxu0 %v1690_v36  ;;  %v778_v22 = vld [vmem:[#allocation8 + $0xe0] sm:$0xff]  ;;  %v780_v23 = vld [vmem:[#allocation8 + $0xf0] sm:$0xff]  ;;  %v1718_v24 = vpack.c.bf16 %v781_v19, %v779_v18  ;;  %v783_v25 = vld [vmem:[#allocation8 + $0x108] sm:$0xff] }
  0xc2   : > { %1754 = vmatprep.subr.bf16.mxu1 %v1690_v36  ;;  %v785_v26 = vld [vmem:[#allocation8 + $0x118] sm:$0xff]  ;;  %v1720_v28 = vpack.c.bf16 %v780_v23, %v778_v22  ;;  %v782_v29 = vld [vmem:[#allocation8 + $0x100] sm:$0xff]  ;;  %v784_v30 = vld [vmem:[#allocation8 + $0x110] sm:$0xff] }
  0xc3   : > { %493 = vmatmul.mubr.f32.vlgmr.msra.gmra.mrb[0].mxu0 %v316_v41  ;;  %v323_v27 = vld [vmem:[%s2473_s10 + $0x38] sm:$0xff]  ;;  %v1722_v31 = vpack.c.bf16 %v785_v26, %v783_v25  ;;  %v787_v32 = vld [vmem:[#allocation8 + $0x128] sm:$0xff]  ;;  %v324_v34 = vld [vmem:[%s2473_s10 + $0x40] sm:$0xff]  ;;  %v1724_v35 = vpack.c.bf16 %v784_v30, %v782_v29 }
  0xc4   : > { %654 = vmatmul.mubr.f32.vlgmr.msra.gmra.mrb[0].mxu1 %v316_v41  ;;  %1693 = vmatpush1.bf16.msra.mxu0 %v1692_v42  ;;  %v789_v33 = vld [vmem:[#allocation8 + $0x138] sm:$0xff]  ;;  %v786_v36 = vld [vmem:[#allocation8 + $0x120] sm:$0xff]  ;;  %v788_v37 = vld [vmem:[#allocation8 + $0x130] sm:$0xff] }
  0xc5   : > { %1770 = vmatpush1.bf16.msra.mxu1 %v1692_v42  ;;  %498 = vmatprep.mubr.f32.mxu0 %v2216_v0  ;;  %v1726_v38 = vpack.c.bf16 %v789_v33, %v787_v32  ;;  %v791_v39 = vld [vmem:[#allocation8 + $0x148] sm:$0xff]  ;;  %v793_v40 = vld [vmem:[#allocation8 + $0x158] sm:$0xff]  ;;  %v1728_v42 = vpack.c.bf16 %v788_v37, %v786_v36  ;;  %v790_v43 = vld [vmem:[#allocation8 + $0x140] sm:$0xff] }
  0xc6   : > { %659 = vmatprep.mubr.f32.mxu1 %v2216_v0  ;;  %1695 = vmatprep.subr.bf16.mxu0 %v1694_v45  ;;  %v325_v41 = vld [vmem:[%s2473_s10 + $0x48] sm:$0xff]  ;;  %v792_v44 = vld [vmem:[#allocation8 + $0x150] sm:$0xff]  ;;  %v797_v47 = vld [vmem:[#allocation8 + $0x178] sm:$0xff] }
  0xc7   : > { %499 = vmatmul.mubr.f32.gmra.mrb[2].mxu0 %v317_v48  ;;  %1755 = vmatprep.subr.bf16.mxu1 %v1694_v45  ;;  %v1730_v45 = vpack.c.bf16 %v793_v40, %v791_v39  ;;  %v795_v46 = vld [vmem:[#allocation8 + $0x168] sm:$0xff]  ;;  %v794_v50 = vld [vmem:[#allocation8 + $0x160] sm:$0xff]  ;;  %v796_v51 = vld [vmem:[#allocation8 + $0x170] sm:$0xff] }
  0xc8   : > { %660 = vmatmul.mubr.f32.gmra.mrb[2].mxu1 %v317_v48  ;;  %1697 = vmatpush1.bf16.msra.mxu0 %v1696_v49  ;;  %v326_v48 = vld [vmem:[%s2473_s10 + $0x50] sm:$0xff]  ;;  %v799_v53 = vld [vmem:[#allocation8 + $0x188] sm:$0xff]  ;;  %v801_v54 = vld [vmem:[#allocation8 + $0x198] sm:$0xff] }
  0xc9   : > { %1771 = vmatpush1.bf16.msra.mxu1 %v1696_v49  ;;  %504 = vmatprep.mubr.f32.mxu0 %v2216_v0  ;;  %v1732_v49 = vpack.c.bf16 %v792_v44, %v790_v43  ;;  %v798_v57 = vld [vmem:[#allocation8 + $0x180] sm:$0xff]  ;;  %v800_v58 = vld [vmem:[#allocation8 + $0x190] sm:$0xff]  ;;  %v803_v60 = vld [vmem:[#allocation8 + $0x1a8] sm:$0xff] }
  0xca   : > { %665 = vmatprep.mubr.f32.mxu1 %v2216_v0  ;;  %1699 = vmatprep.subr.bf16.mxu0 %v1698_v52  ;;  %v805_v61 = vld [vmem:[#allocation8 + $0x1b8] sm:$0xff]  ;;  %v802_v1 = vld [vmem:[#allocation8 + $0x1a0] sm:$0xff]  ;;  %v804_v2 = vld [vmem:[#allocation8 + $0x1b0] sm:$0xff] }
  0xcb   : > { %505 = vmatmul.mubr.f32.gmra.mrb[4].mxu0 %v318_v55  ;;  %1756 = vmatprep.subr.bf16.mxu1 %v1698_v52  ;;  %v1734_v52 = vpack.c.bf16 %v797_v47, %v795_v46  ;;  %v807_v4 = vld [vmem:[#allocation8 + $0x1c8] sm:$0xff]  ;;  %v809_v5 = vld [vmem:[#allocation8 + $0x1d8] sm:$0xff]  ;;  %v806_v8 = vld [vmem:[#allocation8 + $0x1c0] sm:$0xff] }
  0xcc   : > { %666 = vmatmul.mubr.f32.gmra.mrb[4].mxu1 %v318_v55  ;;  %1701 = vmatpush1.bf16.msra.mxu0 %v1700_v56  ;;  %v327_v55 = vld [vmem:[%s2473_s10 + $0x58] sm:$0xff]  ;;  %v808_v9 = vld [vmem:[#allocation8 + $0x1d0] sm:$0xff]  ;;  %v811_v11 = vld [vmem:[#allocation8 + $0x1e8] sm:$0xff] }
  0xcd   : > { %1772 = vmatpush1.bf16.msra.mxu1 %v1700_v56  ;;  %510 = vmatprep.mubr.f32.mxu0 %v2216_v0  ;;  %v1736_v56 = vpack.c.bf16 %v796_v51, %v794_v50  ;;  %v813_v12 = vld [vmem:[#allocation8 + $0x1f8] sm:$0xff]  ;;  %v810_v15 = vld [vmem:[#allocation8 + $0x1e0] sm:$0xff]  ;;  %v812_v16 = vld [vmem:[#allocation8 + $0x1f0] sm:$0xff] }
  0xce   : > { %671 = vmatprep.mubr.f32.mxu1 %v2216_v0  ;;  %1703 = vmatprep.subr.bf16.mxu0 %v1702_v59  ;;  %v331_v18 = vld [vmem:[%s2473_s10 + $0x78] sm:$0xff]  ;;  %v1752_v19 = vpack.c.bf16 %v812_v16, %v810_v15  ;;  %v2552_v22 = vld [vmem:[%s2483_s15] sm:$0xff]  ;;  %v2569_v25 = vld [vmem:[%s2483_s15 + $0x10] sm:$0xff] }
  0xcf   : > { %511 = vmatmul.mubr.f32.gmra.mrb[6].mxu0 %v319_v62  ;;  %1757 = vmatprep.subr.bf16.mxu1 %v1702_v59  ;;  %v1738_v59 = vpack.c.bf16 %v801_v54, %v799_v53  ;;  %v2559_v23 = vld [vmem:[%s2483_s15 + $0x18] sm:$0xff]  ;;  %3443 = vst [vmem:[#allocation18_spill] sm:$0xff] %v2569_v25  ;;  %v2573_v26 = vld [vmem:[%s2483_s15 + $0x90] sm:$0xff]  ;;  %v2585_v29 = vld [vmem:[%s2483_s15 + $0x20] sm:$0xff] }
  0xd0   : > { %672 = vmatmul.mubr.f32.gmra.mrb[6].mxu1 %v319_v62  ;;  %1705 = vmatpush1.bf16.msra.mxu0 %v1704_v63  ;;  %v328_v62 = vld [vmem:[%s2473_s10 + $0x60] sm:$0xff]  ;;  %3442 = vst [vmem:[#allocation17_spill] sm:$0xff] %v2559_v23  ;;  %3446 = vst [vmem:[#allocation21_spill] sm:$0xff] %v2585_v29  ;;  %v2595_v32 = vld [vmem:[%s2483_s15 + $0xb8] sm:$0xff] }
  0xd1   : > { %1773 = vmatpush1.bf16.msra.mxu1 %v1704_v63  ;;  %516 = vmatprep.mubr.f32.mxu0 %v2216_v0  ;;  %v1740_v63 = vpack.c.bf16 %v800_v58, %v798_v57  ;;  %v2589_v30 = vld [vmem:[%s2483_s15 + $0xa0] sm:$0xff]  ;;  %3449 = vst [vmem:[#allocation24_spill] sm:$0xff] %v2595_v32  ;;  %v2601_v33 = vld [vmem:[%s2483_s15 + $0x30] sm:$0xff]  ;;  %v357_v36 = vld [vmem:[%s2483_s15 + $0xc8] sm:$0xff] }
  0xd2   : > { %677 = vmatprep.mubr.f32.mxu1 %v2216_v0  ;;  %1707 = vmatprep.subr.bf16.mxu0 %v1706_v3  ;;  %3447 = vst [vmem:[#allocation22_spill] sm:$0xff] %v2589_v30  ;;  %3450 = vst [vmem:[#allocation25_spill] sm:$0xff] %v2601_v33  ;;  %v2615_v37 = vld [vmem:[%s2483_s15 + $0x40] sm:$0xff]  ;;  %v343_v39 = vld [vmem:[%s2483_s15 + $0x58] sm:$0xff] }
  0xd3   : > { %517 = vmatmul.mubr.f32.gmra.mrb[8].mxu0 %v320_v6  ;;  %1758 = vmatprep.subr.bf16.mxu1 %v1706_v3  ;;  %v1742_v3 = vpack.c.bf16 %v805_v61, %v803_v60  ;;  %3453 = vst [vmem:[#allocation28_spill] sm:$0xff] %v2615_v37  ;;  %v359_v40 = vld [vmem:[%s2483_s15 + $0xd8] sm:$0xff]  ;;  %v345_v43 = vld [vmem:[%s2483_s15 + $0x68] sm:$0xff]  ;;  %v360_v46 = vld [vmem:[%s2483_s15 + $0xe0] sm:$0xff] }
  0xd4   : > { %678 = vmatmul.mubr.f32.gmra.mrb[8].mxu1 %v320_v6  ;;  %1709 = vmatpush1.bf16.msra.mxu0 %v1708_v7  ;;  %v329_v6 = vld [vmem:[%s2473_s10 + $0x68] sm:$0xff]  ;;  %v347_v47 = vld [vmem:[%s2483_s15 + $0x78] sm:$0xff]  ;;  %v362_v50 = vld [vmem:[%s2483_s15 + $0xf0] sm:$0xff] }
  0xd5   : > { %1774 = vmatpush1.bf16.msra.mxu1 %v1708_v7  ;;  %522 = vmatprep.mubr.f32.mxu0 %v2216_v0  ;;  %v1744_v7 = vpack.c.bf16 %v804_v2, %v802_v1  ;;  %v361_v44 = vld [vmem:[%s2483_s15 + $0xe8] sm:$0xff] }
  0xd6   : > { %683 = vmatprep.mubr.f32.mxu1 %v2216_v0  ;;  %1711 = vmatprep.subr.bf16.mxu0 %v1710_v10 }
  0xd7   : > { %523 = vmatmul.mubr.f32.gmra.mrb[10].mxu0 %v321_v13  ;;  %1759 = vmatprep.subr.bf16.mxu1 %v1710_v10  ;;  %v1746_v10 = vpack.c.bf16 %v809_v5, %v807_v4 }
  0xd8   : > { %684 = vmatmul.mubr.f32.gmra.mrb[10].mxu1 %v321_v13  ;;  %1713 = vmatpush1.bf16.msra.mxu0 %v1712_v14  ;;  %v330_v13 = vld [vmem:[%s2473_s10 + $0x70] sm:$0xff] }
  0xd9   : > { %1775 = vmatpush1.bf16.msra.mxu1 %v1712_v14  ;;  %528 = vmatprep.mubr.f32.mxu0 %v2216_v0  ;;  %v1748_v14 = vpack.c.bf16 %v808_v9, %v806_v8 }
  0xda   : > { %689 = vmatprep.mubr.f32.mxu1 %v2216_v0  ;;  %1715 = vmatprep.subr.bf16.mxu0 %v1714_v17 }
  0xdb   : > { %529 = vmatmul.mubr.f32.gmra.mrb[12].mxu0 %v322_v20  ;;  %1760 = vmatprep.subr.bf16.mxu1 %v1714_v17  ;;  %v1750_v17 = vpack.c.bf16 %v813_v12, %v811_v11 }
  0xdc   : > { %690 = vmatmul.mubr.f32.gmra.mrb[12].mxu1 %v322_v20  ;;  %1717 = vmatpush1.bf16.msra.mxu0 %v1716_v21  ;;  %v2546_v20 = vld [vmem:[%s2483_s15 + $0x8] sm:$0xff] }
  0xdd   : > { %1776 = vmatpush1.bf16.msra.mxu1 %v1716_v21  ;;  %534 = vmatprep.mubr.f32.mxu0 %v2216_v0  ;;  %3441 = vst [vmem:[#allocation16_spill] sm:$0xff] %v2546_v20  ;;  %v2549_v21 = vld [vmem:[%s2483_s15 + $0x88] sm:$0xff] }
  0xde   : > { %695 = vmatprep.mubr.f32.mxu1 %v2216_v0  ;;  %1719 = vmatprep.subr.bf16.mxu0 %v1718_v24 }
  0xdf   : > { %535 = vmatmul.mubr.f32.gmra.mrb[14].mxu0 %v323_v27  ;;  %1761 = vmatprep.subr.bf16.mxu1 %v1718_v24  ;;  %v2563_v24 = vld [vmem:[%s2483_s15 + $0x98] sm:$0xff] }
  0xe0   : > { %696 = vmatmul.mubr.f32.gmra.mrb[14].mxu1 %v323_v27  ;;  %1721 = vmatpush1.bf16.msra.mxu0 %v1720_v28  ;;  %v2576_v27 = vld [vmem:[%s2483_s15 + $0x28] sm:$0xff] }
  0xe1   : > { %1777 = vmatpush1.bf16.msra.mxu1 %v1720_v28  ;;  %540 = vmatprep.mubr.f32.mxu0 %v2216_v0  ;;  %3444 = vst [vmem:[#allocation19_spill] sm:$0xff] %v2576_v27  ;;  %v2579_v28 = vld [vmem:[%s2483_s15 + $0xa8] sm:$0xff] }
  0xe2   : > { %701 = vmatprep.mubr.f32.mxu1 %v2216_v0  ;;  %1723 = vmatprep.subr.bf16.mxu0 %v1722_v31  ;;  %3445 = vst [vmem:[#allocation20_spill] sm:$0xff] %v2579_v28 }
  0xe3   : > { %541 = vmatmul.mubr.f32.gmra.mrb[16].mxu0 %v324_v34  ;;  %1762 = vmatprep.subr.bf16.mxu1 %v1722_v31  ;;  %v2592_v31 = vld [vmem:[%s2483_s15 + $0x38] sm:$0xff] }
  0xe4   : > { %702 = vmatmul.mubr.f32.gmra.mrb[16].mxu1 %v324_v34  ;;  %1725 = vmatpush1.bf16.msra.mxu0 %v1724_v35  ;;  %3448 = vst [vmem:[#allocation23_spill] sm:$0xff] %v2592_v31  ;;  %v2605_v34 = vld [vmem:[%s2483_s15 + $0xb0] sm:$0xff] }
  0xe5   : > { %1778 = vmatpush1.bf16.msra.mxu1 %v1724_v35  ;;  %546 = vmatprep.mubr.f32.mxu0 %v2216_v0  ;;  %3451 = vst [vmem:[#allocation26_spill] sm:$0xff] %v2605_v34  ;;  %v2608_v35 = vld [vmem:[%s2483_s15 + $0x48] sm:$0xff] }
  0xe6   : > { %707 = vmatprep.mubr.f32.mxu1 %v2216_v0  ;;  %1727 = vmatprep.subr.bf16.mxu0 %v1726_v38  ;;  %3452 = vst [vmem:[#allocation27_spill] sm:$0xff] %v2608_v35 }
  0xe7   : > { %547 = vmatmul.mubr.f32.gmra.mrb[18].mxu0 %v325_v41  ;;  %1763 = vmatprep.subr.bf16.mxu1 %v1726_v38  ;;  %v2618_v38 = vld [vmem:[%s2483_s15 + $0xc0] sm:$0xff] }
  0xe8   : > { %708 = vmatmul.mubr.f32.gmra.mrb[18].mxu1 %v325_v41  ;;  %1729 = vmatpush1.bf16.msra.mxu0 %v1728_v42  ;;  %3454 = vst [vmem:[#allocation29_spill] sm:$0xff] %v2618_v38  ;;  %v342_v41 = vld [vmem:[%s2483_s15 + $0x50] sm:$0xff] }
  0xe9   : > { %1779 = vmatpush1.bf16.msra.mxu1 %v1728_v42  ;;  %552 = vmatprep.mubr.f32.mxu0 %v2216_v0  ;;  %v358_v42 = vld [vmem:[%s2483_s15 + $0xd0] sm:$0xff] }
  0xea   : > { %713 = vmatprep.mubr.f32.mxu1 %v2216_v0  ;;  %1731 = vmatprep.subr.bf16.mxu0 %v1730_v45 }
  0xeb   : > { %553 = vmatmul.mubr.f32.gmra.mrb[20].mxu0 %v326_v48  ;;  %1764 = vmatprep.subr.bf16.mxu1 %v1730_v45  ;;  %v344_v45 = vld [vmem:[%s2483_s15 + $0x60] sm:$0xff] }
  0xec   : > { %714 = vmatmul.mubr.f32.gmra.mrb[20].mxu1 %v326_v48  ;;  %1733 = vmatpush1.bf16.msra.mxu0 %v1732_v49  ;;  %v363_v48 = vld [vmem:[%s2483_s15 + $0xf8] sm:$0xff] }
  0xed   : > { %1780 = vmatpush1.bf16.msra.mxu1 %v1732_v49  ;;  %558 = vmatprep.mubr.f32.mxu0 %v2216_v0  ;;  %v346_v49 = vld [vmem:[%s2483_s15 + $0x70] sm:$0xff] }
  0xee   : > { %719 = vmatprep.mubr.f32.mxu1 %v2216_v0  ;;  %1735 = vmatprep.subr.bf16.mxu0 %v1734_v52 }
  0xef   : > { %559 = vmatmul.mubr.f32.gmra.mrb[22].mxu0 %v327_v55  ;;  %1765 = vmatprep.subr.bf16.mxu1 %v1734_v52 }
  0xf0   : > { %720 = vmatmul.mubr.f32.gmra.mrb[22].mxu1 %v327_v55  ;;  %1737 = vmatpush1.bf16.msra.mxu0 %v1736_v56 }
  0xf1   : > { %1781 = vmatpush1.bf16.msra.mxu1 %v1736_v56  ;;  %564 = vmatprep.mubr.f32.mxu0 %v2216_v0 }
  0xf2   : > { %725 = vmatprep.mubr.f32.mxu1 %v2216_v0  ;;  %1739 = vmatprep.subr.bf16.mxu0 %v1738_v59 }
  0xf3   : > { %565 = vmatmul.mubr.f32.gmra.mrb[24].mxu0 %v328_v62  ;;  %1766 = vmatprep.subr.bf16.mxu1 %v1738_v59 }
  0xf4   : > { %726 = vmatmul.mubr.f32.gmra.mrb[24].mxu1 %v328_v62  ;;  %1741 = vmatpush1.bf16.msra.mxu0 %v1740_v63 }
  0xf5   : > { %1782 = vmatpush1.bf16.msra.mxu1 %v1740_v63  ;;  %570 = vmatprep.mubr.f32.mxu0 %v2216_v0 }
  0xf6   : > { %731 = vmatprep.mubr.f32.mxu1 %v2216_v0  ;;  %1743 = vmatprep.subr.bf16.mxu0 %v1742_v3 }
  0xf7   : > { %571 = vmatmul.mubr.f32.gmra.mrb[26].mxu0 %v329_v6  ;;  %1767 = vmatprep.subr.bf16.mxu1 %v1742_v3 }
  0xf8   : > { %732 = vmatmul.mubr.f32.gmra.mrb[26].mxu1 %v329_v6  ;;  %1745 = vmatpush1.bf16.msra.mxu0 %v1744_v7 }
  0xf9   : > { %1783 = vmatpush1.bf16.msra.mxu1 %v1744_v7  ;;  %576 = vmatprep.mubr.f32.mxu0 %v2216_v0 }
  0xfa   : > { %737 = vmatprep.mubr.f32.mxu1 %v2216_v0  ;;  %1747 = vmatprep.subr.bf16.mxu0 %v1746_v10 }
  0xfb   : > { %577 = vmatmul.mubr.f32.gmra.mrb[28].mxu0 %v330_v13  ;;  %1768 = vmatprep.subr.bf16.mxu1 %v1746_v10 }
  0xfc   : > { %738 = vmatmul.mubr.f32.gmra.mrb[28].mxu1 %v330_v13  ;;  %1749 = vmatpush1.bf16.msra.mxu0 %v1748_v14 }
  0xfd   : > { %1784 = vmatpush1.bf16.msra.mxu1 %v1748_v14  ;;  %582 = vmatprep.mubr.f32.mxu0 %v2216_v0 }
  0xfe   : > { %743 = vmatprep.mubr.f32.mxu1 %v2216_v0  ;;  %1751 = vmatprep.subr.bf16.mxu0 %v1750_v17  ;;  %v2556_v0 = vld [vmem:[%s2483_s15 + $0x80] sm:$0xff] }
  0xff   : > { %583 = vmatmul.mubr.f32.gmra.mrb[30].mxu0 %v331_v18  ;;  %1769 = vmatprep.subr.bf16.mxu1 %v1750_v17 }
 0x100   : > { %744 = vmatmul.mubr.f32.gmra.mrb[30].mxu1 %v331_v18  ;;  %1753 = vmatpush1.bf16.msra.mxu0 %v1752_v19 }
 0x101   : > { %1785 = vmatpush1.bf16.msra.mxu1 %v1752_v19  ;;  %878 = vmatprep.mubr.f32.mxu0 %v2546_v20 }
 0x102   : > { %926 = vmatprep.mubr.f32.mxu1 %v2549_v21 }
 0x103   : > { %879 = vmatmul.mubr.f32.vlgmr.msra.gmra.mrb[32].mxu0 %v2552_v22 }
 0x104   : > { %927 = vmatmul.mubr.f32.vlgmr.msra.gmra.mrb[32].mxu1 %v2556_v0  ;;  %884 = vmatprep.mubr.f32.mxu0 %v2559_v23 }
 0x105   : > { %932 = vmatprep.mubr.f32.mxu1 %v2563_v24 }
 0x107   : > { %885 = vmatmul.mubr.f32.gmra.mrb[34].mxu0 %v2569_v25 }
 0x108   : > { %933 = vmatmul.mubr.f32.gmra.mrb[34].mxu1 %v2573_v26  ;;  %890 = vmatprep.mubr.f32.mxu0 %v2576_v27 }
 0x109   : > { %938 = vmatprep.mubr.f32.mxu1 %v2579_v28 }
 0x10b   : > { %891 = vmatmul.mubr.f32.gmra.mrb[36].mxu0 %v2585_v29 }
 0x10c   : > { %939 = vmatmul.mubr.f32.gmra.mrb[36].mxu1 %v2589_v30  ;;  %896 = vmatprep.mubr.f32.mxu0 %v2592_v31 }
 0x10d   : > { %944 = vmatprep.mubr.f32.mxu1 %v2595_v32 }
 0x10f   : > { %897 = vmatmul.mubr.f32.gmra.mrb[38].mxu0 %v2601_v33 }
 0x110   : > { %945 = vmatmul.mubr.f32.gmra.mrb[38].mxu1 %v2605_v34  ;;  %902 = vmatprep.mubr.f32.mxu0 %v2608_v35 }
 0x111   : > { %950 = vmatprep.mubr.f32.mxu1 %v357_v36 }
 0x113   : > { %903 = vmatmul.mubr.f32.gmra.mrb[40].mxu0 %v2615_v37 }
 0x114   : > { %951 = vmatmul.mubr.f32.gmra.mrb[40].mxu1 %v2618_v38  ;;  %908 = vmatprep.mubr.f32.mxu0 %v343_v39 }
 0x115   : > { %956 = vmatprep.mubr.f32.mxu1 %v359_v40 }
 0x117   : > { %909 = vmatmul.mubr.f32.gmra.mrb[42].mxu0 %v342_v41 }
 0x118   : > { %957 = vmatmul.mubr.f32.gmra.mrb[42].mxu1 %v358_v42  ;;  %914 = vmatprep.mubr.f32.mxu0 %v345_v43 }
 0x119   : > { %962 = vmatprep.mubr.f32.mxu1 %v361_v44 }
 0x11b   : > { %915 = vmatmul.mubr.f32.gmra.mrb[44].mxu0 %v344_v45 }
 0x11c   : > { %963 = vmatmul.mubr.f32.gmra.mrb[44].mxu1 %v360_v46  ;;  %920 = vmatprep.mubr.f32.mxu0 %v347_v47 }
 0x11d   : > { %968 = vmatprep.mubr.f32.mxu1 %v363_v48 }
 0x11f   : > { %921 = vmatmul.mubr.f32.gmra.mrb[46].mxu0 %v346_v49 }
 0x120   : > { %969 = vmatmul.mubr.f32.gmra.mrb[46].mxu1 %v362_v50 }
 0x196   : > { %v2634_v51 = vpop.f32.mrb[0].mxu0 }
 0x197   : > { %v2636_v52 = vpop.f32.mrb[0].mxu1  ;;  %v2638_v53 = vpop.f32.mrb[1].mxu0 }
 0x198   : > { %3455 = vst [vmem:[#allocation30_spill] sm:$0xff] %v2638_v53  ;;  %v2640_v54 = vpop.f32.mrb[1].mxu1 }
 0x19a   : > { %v2642_v55 = vpop.f32.mrb[2].mxu0 }
 0x19b   : > { %3456 = vst [vmem:[#allocation31_spill] sm:$0xff] %v2642_v55  ;;  %v2644_v56 = vpop.f32.mrb[2].mxu1  ;;  %v2646_v57 = vpop.f32.mrb[3].mxu0 }
 0x19c   : > { %v2648_v58 = vpop.f32.mrb[3].mxu1 }
 0x19e   : > { %v2650_v59 = vpop.f32.mrb[4].mxu0 }
 0x19f   : > { %v2652_v60 = vpop.f32.mrb[4].mxu1  ;;  %v2654_v61 = vpop.f32.mrb[5].mxu0 }
 0x1a0   : > { %3457 = vst [vmem:[#allocation32_spill] sm:$0xff] %v2654_v61  ;;  %v2656_v62 = vpop.f32.mrb[5].mxu1 }
 0x1a2   : > { %v2658_v63 = vpop.f32.mrb[6].mxu0 }
 0x1a3   : > { %3458 = vst [vmem:[#allocation33_spill] sm:$0xff] %v2658_v63  ;;  %v2660_v1 = vpop.f32.mrb[6].mxu1  ;;  %v2662_v2 = vpop.f32.mrb[7].mxu0 }
 0x1a4   : > { %3459 = vst [vmem:[#allocation34_spill] sm:$0xff] %v2662_v2  ;;  %v2664_v3 = vpop.f32.mrb[7].mxu1 }
 0x1a6   : > { %v2666_v4 = vpop.f32.mrb[8].mxu0 }
 0x1a7   : > { %3460 = vst [vmem:[#allocation35_spill] sm:$0xff] %v2666_v4  ;;  %v2668_v5 = vpop.f32.mrb[8].mxu1  ;;  %v2670_v6 = vpop.f32.mrb[9].mxu0 }
 0x1a8   : > { %3461 = vst [vmem:[#allocation36_spill] sm:$0xff] %v2668_v5  ;;  %3462 = vst [vmem:[#allocation37_spill] sm:$0xff] %v2670_v6  ;;  %v2672_v7 = vpop.f32.mrb[9].mxu1 }
 0x1a9   : > { %3463 = vst [vmem:[#allocation38_spill] sm:$0xff] %v2672_v7 }
 0x1aa   : > { %v2674_v8 = vpop.f32.mrb[10].mxu0 }
 0x1ab   : > { %3464 = vst [vmem:[#allocation39_spill] sm:$0xff] %v2674_v8  ;;  %v2676_v9 = vpop.f32.mrb[10].mxu1  ;;  %v2678_v10 = vpop.f32.mrb[11].mxu0 }
 0x1ac   : > { %3465 = vst [vmem:[#allocation40_spill] sm:$0xff] %v2676_v9  ;;  %3466 = vst [vmem:[#allocation41_spill] sm:$0xff] %v2678_v10  ;;  %v2680_v11 = vpop.f32.mrb[11].mxu1 }
 0x1ad   : > { %3467 = vst [vmem:[#allocation42_spill] sm:$0xff] %v2680_v11 }
 0x1ae   : > { %v2682_v12 = vpop.f32.mrb[12].mxu0 }
 0x1af   : > { %3468 = vst [vmem:[#allocation43_spill] sm:$0xff] %v2682_v12  ;;  %v2684_v13 = vpop.f32.mrb[12].mxu1  ;;  %v2686_v14 = vpop.f32.mrb[13].mxu0 }
 0x1b0   : > { %3469 = vst [vmem:[#allocation44_spill] sm:$0xff] %v2684_v13  ;;  %3470 = vst [vmem:[#allocation45_spill] sm:$0xff] %v2686_v14  ;;  %v2688_v15 = vpop.f32.mrb[13].mxu1  ;;  %v3507_v32 = vld [vmem:[#allocation38_spill] sm:$0xff] }
 0x1b1   : > { %3471 = vst [vmem:[#allocation46_spill] sm:$0xff] %v2688_v15 }
 0x1b2   : > { %v2690_v16 = vpop.f32.mrb[14].mxu0 }
 0x1b3   : > { %3472 = vst [vmem:[#allocation47_spill] sm:$0xff] %v2690_v16  ;;  %v2692_v17 = vpop.f32.mrb[14].mxu1  ;;  %v2694_v18 = vpop.f32.mrb[15].mxu0 }
 0x1b4   : > { %3473 = vst [vmem:[#allocation48_spill] sm:$0xff] %v2692_v17  ;;  %3474 = vst [vmem:[#allocation49_spill] sm:$0xff] %v2694_v18  ;;  %v2696_v19 = vpop.f32.mrb[15].mxu1  ;;  %v1009_v17 = vlaneseq }
 0x1b5   : > { %3475 = vst [vmem:[#allocation50_spill] sm:$0xff] %v2696_v19 }
 0x1b6   : > { %v2698_v36 = vpop.f32.mrb[16].mxu0  ;;  %v1010_v13 = vshrl.u32 %v1009_v17, 7 }
 0x1b7   : > { %v703_v39 = vpop.f32.mrb[16].mxu1  ;;  %v2700_v40 = vpop.f32.mrb[17].mxu0 }
 0x1b8   : > { %v705_v41 = vpop.f32.mrb[17].mxu1 }
 0x1ba   : > { %v2702_v42 = vpop.f32.mrb[18].mxu0 }
 0x1bb   : > { %v2704_v43 = vpop.f32.mrb[18].mxu1  ;;  %v2706_v44 = vpop.f32.mrb[19].mxu0 }
 0x1bc   : > { %v2708_v45 = vpop.f32.mrb[19].mxu1 }
 0x1be   : > { %v2710_v46 = vpop.f32.mrb[20].mxu0 }
 0x1bf   : > { %3476 = vst [vmem:[#allocation51_spill] sm:$0xff] %v2710_v46  ;;  %v2712_v47 = vpop.f32.mrb[20].mxu1  ;;  %v2714_v48 = vpop.f32.mrb[21].mxu0 }
 0x1c0   : > { %3477 = vst [vmem:[#allocation52_spill] sm:$0xff] %v2714_v48  ;;  %v2716_v49 = vpop.f32.mrb[21].mxu1 }
 0x1c2   : > { %v2718_v50 = vpop.f32.mrb[22].mxu0 }
 0x1c3   : > { %3478 = vst [vmem:[#allocation53_spill] sm:$0xff] %v2718_v50  ;;  %v2720_v18 = vpop.f32.mrb[22].mxu1  ;;  %v2722_v16 = vpop.f32.mrb[23].mxu0 }
 0x1c4   : > { %3479 = vst [vmem:[#allocation54_spill] sm:$0xff] %v2722_v16  ;;  %v2724_v14 = vpop.f32.mrb[23].mxu1 }
 0x1c6   : > { %v2726_v12 = vpop.f32.mrb[24].mxu0 }
 0x1c7   : > { %3480 = vst [vmem:[#allocation55_spill] sm:$0xff] %v2726_v12  ;;  %v2728_v10 = vpop.f32.mrb[24].mxu1  ;;  %v2730_v8 = vpop.f32.mrb[25].mxu0 }
 0x1c8   : > { %3481 = vst [vmem:[#allocation56_spill] sm:$0xff] %v2728_v10  ;;  %3482 = vst [vmem:[#allocation57_spill] sm:$0xff] %v2730_v8  ;;  %v2732_v19 = vpop.f32.mrb[25].mxu1  ;;  %v1011_v8 = vsub.s32 0, %v1010_v13 }
 0x1c9   : > { %3483 = vst [vmem:[#allocation58_spill] sm:$0xff] %v2732_v19 }
 0x1ca   : > { %v2734_v38 = vpop.f32.mrb[26].mxu0 }
 0x1cb   : > { %3484 = vst [vmem:[#allocation59_spill] sm:$0xff] %v2734_v38  ;;  %v2736_v6 = vpop.f32.mrb[26].mxu1  ;;  %v2738_v35 = vpop.f32.mrb[27].mxu0  ;;  %v1007_v38 = vld [vmem:[%s3375_s4] sm:$0x3] }
 0x1cc   : > { %3485 = vst [vmem:[#allocation60_spill] sm:$0xff] %v2736_v6  ;;  %3486 = vst [vmem:[#allocation61_spill] sm:$0xff] %v2738_v35  ;;  %v2740_v15 = vpop.f32.mrb[27].mxu1  ;;  %v1015_v6 = vsub.s32 1, %v1010_v13 }
 0x1cd   : > { %3487 = vst [vmem:[#allocation62_spill] sm:$0xff] %v2740_v15 }
 0x1ce   : > { %v2742_v4 = vpop.f32.mrb[28].mxu0 }
 0x1cf   : > { %3488 = vst [vmem:[#allocation63_spill] sm:$0xff] %v2742_v4  ;;  %v2744_v37 = vpop.f32.mrb[28].mxu1  ;;  %v2746_v12 = vpop.f32.mrb[29].mxu0  ;;  %v2761_v4 = vrot.slane %v1007_v38, %v1011_v8 }
 0x1d0   : > { %3489 = vst [vmem:[#allocation64_spill] sm:$0xff] %v2744_v37  ;;  %3490 = vst [vmem:[#allocation65_spill] sm:$0xff] %v2746_v12  ;;  %v2748_v11 = vpop.f32.mrb[29].mxu1  ;;  %v2763_v12 = vrot.slane %v1007_v38, %v1015_v6 }
 0x1d1   : > { %3491 = vst [vmem:[#allocation66_spill] sm:$0xff] %v2748_v11 }
 0x1d2   : > { %v2750_v9 = vpop.f32.mrb[30].mxu0 }
 0x1d3   : > { %3492 = vst [vmem:[#allocation67_spill] sm:$0xff] %v2750_v9  ;;  %v2755_v35 = vpop.f32.mrb[30].mxu1  ;;  %v2757_v15 = vpop.f32.mrb[31].mxu0 }
 0x1d4   : > { %3493 = vst [vmem:[#allocation68_spill] sm:$0xff] %v2755_v35  ;;  %3494 = vst [vmem:[#allocation69_spill] sm:$0xff] %v2757_v15  ;;  %v2759_v17 = vpop.f32.mrb[31].mxu1 }
 0x1d5   : > { %3495 = vst [vmem:[#allocation70_spill] sm:$0xff] %v2759_v17 }
 0x1d6   : > { %v880_v37 = vpop.f32.mrb[32].mxu0 }
 0x1d7   : > { %v975_v11 = vsub.f32 %v2636_v52, %v880_v37  ;;  %v928_v19 = vpop.f32.mrb[32].mxu1  ;;  %v882_v9 = vpop.f32.mrb[33].mxu0 }
 0x1d8   : > { %v991_v7 = vsub.f32 %v703_v39, %v928_v19  ;;  %v976_v10 = vsub.f32 %v2640_v54, %v882_v9  ;;  %v930_v5 = vpop.f32.mrb[33].mxu1 }
 0x1d9   : > { %v2768_v13 = vadd.f32 %v2761_v4, %v975_v11  ;;  %v992_v35 = vsub.f32 %v705_v41, %v930_v5 }
 0x1da   : > { %v2771_v15 = vadd.f32 %v2761_v4, %v991_v7  ;;  %v2774_v8 = vadd.f32 %v2763_v12, %v976_v10  ;;  %v886_v38 = vpop.f32.mrb[34].mxu0 }
 0x1db   : > { %v1051_v52 = vand.u32 2147483647, %v2768_v13  ;;  %v2780_v6 = vadd.f32 %v2763_v12, %v992_v35  ;;  %v977_v54 = vsub.f32 %v2644_v56, %v886_v38  ;;  %v934_v9 = vpop.f32.mrb[34].mxu1  ;;  %v888_v11 = vpop.f32.mrb[35].mxu0  ;;  %vm1243_vm0 = vcmp.ge.f32.partialorder %v2768_v13, 0.0 }
 0x1dc   : > { %v1067_v10 = vand.u32 2147483647, %v2771_v15  ;;  %v1052_v19 = vand.u32 2147483647, %v2774_v8  ;;  %v936_v38 = vpop.f32.mrb[35].mxu1  ;;  %v993_v5 = vsub.f32 %v2704_v43, %v934_v9  ;;  %v978_v7 = vsub.f32 %v2648_v58, %v888_v11 }
 0x1dd   : > { %v1083_v41 = vsub.f32 0.0, %v1051_v52  ;;  %v1068_v35 = vand.u32 2147483647, %v2780_v6  ;;  %v2793_v56 = vadd.f32 %v2761_v4, %v977_v54  ;;  %v994_v11 = vsub.f32 %v2708_v45, %v936_v38 }
 0x1de   : > { %v1099_v37 = vsub.f32 0.0, %v1067_v10  ;;  %v1084_v17 = vsub.f32 0.0, %v1052_v19  ;;  %v892_v25 = vpop.f32.mrb[36].mxu0  ;;  %v2801_v54 = vadd.f32 %v2761_v4, %v993_v5  ;;  %v2804_v10 = vadd.f32 %v2763_v12, %v978_v7 }
 0x1df   : > { %v1115_v20 = vmul.f32 1.442695, %v1083_v41  ;;  %v1100_v53 = vsub.f32 0.0, %v1068_v35  ;;  %v1053_v52 = vand.u32 2147483647, %v2793_v56  ;;  %v940_v19 = vpop.f32.mrb[36].mxu1  ;;  %v3509_v13 = vsub.f32 %v2698_v36, %v2556_v0 }
 0x1e0   : > { %v1147_v39 = vmul.f32 1.442695, %v1099_v37  ;;  %v1117_v23 = vmul.f32 1.442695, %v1084_v17  ;;  %v894_v43 = vpop.f32.mrb[37].mxu0  ;;  %v942_v55 = vpop.f32.mrb[37].mxu1 }
 0x1e1   : > { %1867 = vpow2.f32 %v1115_v20  ;;  %v1149_v58 = vmul.f32 1.442695, %v1100_v53  ;;  %v1085_v9 = vsub.f32 0.0, %v1053_v52  ;;  %v1069_v17 = vand.u32 2147483647, %v2801_v54 }
 0x1e2   : > { %1869 = vpow2.f32 %v1147_v39  ;;  %v1054_v37 = vand.u32 2147483647, %v2804_v10  ;;  %v898_v5 = vpop.f32.mrb[38].mxu0  ;;  %v2814_v20 = vadd.f32 %v2763_v12, %v994_v11  ;;  %v979_v52 = vsub.f32 %v2652_v60, %v892_v25 }
 0x1e3   : > { %1871 = vpow2.f32 %v1117_v23  ;;  %v1119_v35 = vmul.f32 1.442695, %v1085_v9  ;;  %v2816_v53 = vpop.f32.mrb[38].mxu1  ;;  %v2818_v45 = vpop.f32.mrb[39].mxu0  ;;  %v1101_v38 = vsub.f32 0.0, %v1069_v17  ;;  %v995_v9 = vsub.f32 %v2712_v47, %v940_v19 }
 0x1e4   : > { %1873 = vpow2.f32 %v1149_v58  ;;  %v1086_v39 = vsub.f32 0.0, %v1054_v37  ;;  %v2821_v41 = vpop.f32.mrb[39].mxu1  ;;  %v1070_v23 = vand.u32 2147483647, %v2814_v20  ;;  %v2828_v33 = vadd.f32 %v2761_v4, %v979_v52 }
 0x1e5   : > { %1875 = vpow2.f32 %v1119_v35  ;;  %v1151_v11 = vmul.f32 1.442695, %v1101_v38  ;;  %v980_v58 = vsub.f32 %v2656_v62, %v894_v43  ;;  %v2834_v60 = vadd.f32 %v2761_v4, %v995_v9 }
 0x1e6   : > { %v1121_v7 = vmul.f32 1.442695, %v1086_v39  ;;  %v2831_v17 = vpop.f32.mrb[40].mxu0  ;;  %v1102_v25 = vsub.f32 0.0, %v1070_v23  ;;  %v996_v37 = vsub.f32 %v2716_v49, %v942_v55  ;;  %v981_v35 = vsub.f32 %v2660_v1, %v898_v5 }
 0x1e7   : > { %v2838_v27 = vpop.f32.mrb[40].mxu1  ;;  %v2840_v47 = vpop.f32.mrb[41].mxu0  ;;  %1877 = vpow2.f32 %v1151_v11  ;;  %v1055_v62 = vand.u32 2147483647, %v2828_v33  ;;  %v2846_v43 = vadd.f32 %v2763_v12, %v980_v58  ;;  %v1071_v49 = vand.u32 2147483647, %v2834_v60 }
 0x1e8   : > { %v2848_v38 = vpop.f32.mrb[41].mxu1  ;;  %1879 = vpow2.f32 %v1121_v7  ;;  %v1153_v1 = vmul.f32 1.442695, %v1102_v25  ;;  %v2857_v23 = vadd.f32 %v2763_v12, %v996_v37  ;;  %v2864_v7 = vadd.f32 %v2761_v4, %v981_v35 }
 0x1e9   : > { %v1087_v39 = vsub.f32 0.0, %v1055_v62  ;;  %v1056_v52 = vand.u32 2147483647, %v2846_v43  ;;  %v1103_v58 = vsub.f32 0.0, %v1071_v49  ;;  %v997_v25 = vsub.f32 %v2720_v18, %v2816_v53 }
 0x1ea   : > { %v2859_v9 = vpop.f32.mrb[42].mxu0  ;;  %1881 = vpow2.f32 %v1153_v1  ;;  %v1072_v2 = vand.u32 2147483647, %v2857_v23  ;;  %vm1259_vm1 = vcmp.ge.f32.partialorder %v2771_v15, 0.0  ;;  %vm1244_vm2 = vcmp.ge.f32.partialorder %v2774_v8, 0.0 }
 0x1eb   : > { %v2861_v11 = vpop.eup %1867  ;;  %v2868_v55 = vpop.f32.mrb[42].mxu1  ;;  %v1088_v49 = vsub.f32 0.0, %v1056_v52  ;;  %v1123_v31 = vmul.f32 1.442695, %v1087_v39  ;;  %v1057_v52 = vand.u32 2147483647, %v2864_v7  ;;  %v2906_v50 = vadd.f32 %v2761_v4, %v997_v25 }
 0x1ec   : > { %v2870_v62 = vpop.f32.mrb[43].mxu0  ;;  %v2872_v5 = vpop.eup %1869  ;;  %v1179_v1 = vadd.f32 1.0, %v2861_v11  ;;  %v1155_v48 = vmul.f32 1.442695, %v1103_v58  ;;  %v1104_v29 = vsub.f32 0.0, %v1072_v2  ;;  %v998_v58 = vsub.f32 %v2724_v14, %v2821_v41  ;;  %v3500_v25 = vld [vmem:[#allocation36_spill] sm:$0xff] }
 0x1ed   : > { %v2879_v35 = vpop.eup %1871  ;;  %v1195_v53 = vadd.f32 1.0, %v2872_v5  ;;  %v2891_v61 = vpop.f32.mrb[43].mxu1  ;;  %v1125_v34 = vmul.f32 1.442695, %v1088_v49  ;;  %v1073_v49 = vand.u32 2147483647, %v2906_v50  ;;  %v984_v16 = vsub.f32 %v3507_v32, %v2840_v47 }
 0x1ee   : > { %v2885_v63 = vpop.eup %1873  ;;  %1883 = vrcp.f32 %v1179_v1  ;;  %v1180_v19 = vadd.f32 1.0, %v2879_v35  ;;  %v2893_v30 = vpop.f32.mrb[44].mxu0  ;;  %v2930_v14 = vadd.f32 %v2763_v12, %v998_v58  ;;  %vm1260_vm3 = vcmp.ge.f32.partialorder %v2780_v6, 0.0 }
 0x1ef   : > { %3496 = vst [vmem:[#allocation71_spill] sm:$0xff] %v2893_v30  ;;  %v2895_v18 = vpop.eup %1875  ;;  %1885 = vrcp.f32 %v1195_v53  ;;  %v1196_v28 = vadd.f32 1.0, %v2885_v63  ;;  %v2900_v46 = vpop.f32.mrb[44].mxu1  ;;  %v982_v53 = vsub.f32 %v2664_v3, %v2818_v45  ;;  %v1157_v58 = vmul.f32 1.442695, %v1104_v29  ;;  %v3506_v29 = vld [vmem:[#allocation56_spill] sm:$0xff] }
 0x1f0   : > { %3497 = vst [vmem:[#allocation72_spill] sm:$0xff] %v2900_v46  ;;  %v2902_v1 = vpop.f32.mrb[45].mxu0  ;;  %1887 = vrcp.f32 %v1180_v19  ;;  %v1181_v37 = vadd.f32 1.0, %v2895_v18  ;;  %v2908_v30 = vpop.f32.mrb[45].mxu1  ;;  %v1089_v19 = vsub.f32 0.0, %v1057_v52  ;;  %3502 = vst [vmem:[#allocation75_spill] sm:$0xff] %v2930_v14 }
 0x1f1   : > { %3498 = vst [vmem:[#allocation73_spill] sm:$0xff] %v2902_v1  ;;  %3499 = vst [vmem:[#allocation74_spill] sm:$0xff] %v2908_v30  ;;  %1889 = vrcp.f32 %v1196_v28  ;;  %v2914_v39 = vpop.eup %1877  ;;  %v983_v1 = vsub.f32 %v3500_v25, %v2831_v17  ;;  %v2927_v3 = vadd.f32 %v2763_v12, %v982_v53  ;;  %vm1245_vm4 = vcmp.ge.f32.partialorder %v2793_v56, 0.0 }
 0x1f2   : > { %1891 = vrcp.f32 %v1181_v37  ;;  %v2920_v30 = vpop.f32.mrb[46].mxu0  ;;  %v2922_v28 = vpop.eup %1879  ;;  %v1197_v2 = vadd.f32 1.0, %v2914_v39  ;;  %v1105_v37 = vsub.f32 0.0, %v1073_v49  ;;  %vm1261_vm5 = vcmp.ge.f32.partialorder %v2801_v54, 0.0  ;;  %v3518_v54 = vld [vmem:[#allocation17_spill] sm:$0xff] }
 0x1f3   : > { %3501 = vst [vmem:[#allocation36_spill] sm:$0xff] %v2920_v30  ;;  %1893 = vpow2.f32 %v1123_v31  ;;  %v2932_v41 = vpop.f32.mrb[46].mxu1  ;;  %v2934_v45 = vpop.f32.mrb[47].mxu0  ;;  %v1182_v17 = vadd.f32 1.0, %v2922_v28  ;;  %v2939_v52 = vadd.f32 %v2761_v4, %v983_v1  ;;  %v1058_v25 = vand.u32 2147483647, %v2927_v3 }
 0x1f4   : > { %3503 = vst [vmem:[#allocation76_spill] sm:$0xff] %v2932_v41  ;;  %3504 = vst [vmem:[#allocation77_spill] sm:$0xff] %v2934_v45  ;;  %1895 = vpow2.f32 %v1155_v48  ;;  %v2941_v31 = vpop.f32.mrb[47].mxu1  ;;  %v2943_v53 = vpop.eup %1881  ;;  %v1074_v45 = vand.u32 2147483647, %v2930_v14  ;;  %vm1246_vm6 = vcmp.ge.f32.partialorder %v2804_v10, 0.0 }
 0x1f5   : > { %3505 = vst [vmem:[#allocation78_spill] sm:$0xff] %v2941_v31  ;;  %1897 = vrcp.f32 %v1197_v2  ;;  %v1198_v41 = vadd.f32 1.0, %v2943_v53  ;;  %v1127_v48 = vmul.f32 1.442695, %v1089_v19  ;;  %v1159_v49 = vmul.f32 1.442695, %v1105_v37 }
 0x1f6   : > { %1899 = vrcp.f32 %v1182_v17  ;;  %v1090_v1 = vsub.f32 0.0, %v1058_v25  ;;  %v1106_v30 = vsub.f32 0.0, %v1074_v45  ;;  %v1059_v31 = vand.u32 2147483647, %v2939_v52 }
 0x1f7   : > { %1901 = vpow2.f32 %v1125_v34  ;;  %v999_v2 = vsub.f32 %v3506_v29, %v2838_v27  ;;  %vm1262_vm7 = vcmp.ge.f32.partialorder %v2814_v20, 0.0  ;;  %vm1247_vm8 = vcmp.ge.f32.partialorder %v2828_v33, 0.0  ;;  %v3529_v33 = vld [vmem:[#allocation22_spill] sm:$0xff] }
 0x1f8   : > { %v1884_v46 = vpop.eup %1883  ;;  %1903 = vrcp.f32 %v1198_v41  ;;  %v1129_v34 = vmul.f32 1.442695, %v1090_v1  ;;  %v1161_v19 = vmul.f32 1.442695, %v1106_v30  ;;  %v1091_v41 = vsub.f32 0.0, %v1059_v31 }
 0x1f9   : > { %v1886_v17 = vpop.eup %1885  ;;  %v1275_v14 = vmul.f32 %v1884_v46, %v2861_v11  ;;  %1905 = vpow2.f32 %v1157_v58  ;;  %v2960_v27 = vadd.f32 %v2761_v4, %v999_v2  ;;  %v2966_v11 = vadd.f32 %v2763_v12, %v984_v16 }
 0x1fa   : > { %v1888_v45 = vpop.eup %1887  ;;  %v1291_v37 = vmul.f32 %v1886_v17, %v2872_v5  ;;  %1907 = vpow2.f32 %v1127_v48  ;;  %v3508_v5 = vsub.f32 %v2634_v51, %v2552_v22  ;;  %vm1263_vm9 = vcmp.ge.f32.partialorder %v2834_v60, 0.0 }
 0x1fb   : > { %v1890_v25 = vpop.eup %1889  ;;  %v1307_v32 = vsel %vm1243_vm0, %v1884_v46, %v1275_v14  ;;  %v1276_v47 = vmul.f32 %v1888_v45, %v2879_v35  ;;  %1909 = vpow2.f32 %v1159_v49  ;;  %v3510_v14 = vld [vmem:[#allocation30_spill] sm:$0xff]  ;;  %v3511_v49 = vld [vmem:[#allocation16_spill] sm:$0xff]  ;;  %vm1248_vm10 = vcmp.ge.f32.partialorder %v2846_v43, 0.0 }
 0x1fc   : > { %v1892_v30 = vpop.eup %1891  ;;  %v1371_v58 = vmul.f32 %v3508_v5, %v1307_v32  ;;  %v1323_v31 = vsel %vm1259_vm1, %v1886_v17, %v1291_v37  ;;  %v1292_v48 = vmul.f32 %v1890_v25, %v2885_v63  ;;  %1911 = vpow2.f32 %v1129_v34  ;;  %v3515_v37 = vld [vmem:[#allocation18_spill] sm:$0xff] }
 0x1fd   : > { %v2975_v46 = vpop.eup %1893  ;;  %v1387_v16 = vmul.f32 %v3509_v13, %v1323_v31  ;;  %v1308_v35 = vsel %vm1244_vm2, %v1888_v45, %v1276_v47  ;;  %v1277_v51 = vmul.f32 %v1892_v30, %v2895_v18  ;;  %1913 = vpow2.f32 %v1161_v19 }
 0x1fe   : > { %v2983_v15 = vpop.eup %1895  ;;  %v1403_v63 = vadd.f32 %v1371_v58, %v2552_v22  ;;  %v3512_v1 = vsub.f32 %v3510_v14, %v3511_v49  ;;  %v1324_v2 = vsel %vm1260_vm3, %v1890_v25, %v1292_v48  ;;  %v1183_v36 = vadd.f32 1.0, %v2975_v46 }
 0x1ff   : > { %v1898_v17 = vpop.eup %1897  ;;  %v1419_v8 = vadd.f32 %v1387_v16, %v2556_v0  ;;  %v3513_v18 = vsub.f32 %v2700_v40, %v2549_v21  ;;  %v1309_v19 = vsel %vm1245_vm4, %v1892_v30, %v1277_v51  ;;  %v1199_v22 = vadd.f32 1.0, %v2983_v15  ;;  %v3514_v0 = vld [vmem:[#allocation31_spill] sm:$0xff] }
 0x200   : > { %v1372_v29 = vmul.f32 %v3512_v1, %v1308_v35  ;;  %v1900_v45 = vpop.eup %1899  ;;  %1435 = vst [vmem:[%s3001_s28] sm:$0xff] %v1403_v63  ;;  %v3516_v25 = vsub.f32 %v3514_v0, %v3515_v37  ;;  %v1293_v56 = vmul.f32 %v1898_v17, %v2914_v39  ;;  %1915 = vrcp.f32 %v1183_v36  ;;  %v3522_v0 = vld [vmem:[#allocation40_spill] sm:$0xff] }
 0x201   : > { %v1388_v34 = vmul.f32 %v3513_v18, %v1324_v2  ;;  %v3009_v32 = vpop.eup %1901  ;;  %1451 = vst [vmem:[%s3001_s28 + $0x80] sm:$0xff] %v1419_v8  ;;  %v1278_v30 = vmul.f32 %v1900_v45, %v2922_v28  ;;  %1917 = vrcp.f32 %v1199_v22  ;;  %v1131_v5 = vmul.f32 1.442695, %v1091_v41 }
 0x202   : > { %v1404_v6 = vadd.f32 %v1372_v29, %v3511_v49  ;;  %v1373_v40 = vmul.f32 %v3516_v25, %v1309_v19  ;;  %v1904_v58 = vpop.eup %1903  ;;  %v1325_v48 = vsel %vm1261_vm5, %v1898_v17, %v1293_v56  ;;  %v1184_v39 = vadd.f32 1.0, %v3009_v32  ;;  %v3524_v56 = vld [vmem:[#allocation42_spill] sm:$0xff] }
 0x203   : > { %v1420_v47 = vadd.f32 %v1388_v34, %v2549_v21  ;;  %v1075_v13 = vand.u32 2147483647, %v2960_v27  ;;  %v3020_v16 = vpop.eup %1905  ;;  %v3517_v21 = vsub.f32 %v2702_v42, %v2573_v26  ;;  %v1310_v41 = vsel %vm1246_vm6, %v1900_v45, %v1278_v30  ;;  %v3521_v45 = vld [vmem:[#allocation58_spill] sm:$0xff] }
 0x204   : > { %1436 = vst [vmem:[%s3001_s28 + $0x8] sm:$0xff] %v1404_v6  ;;  %v1405_v31 = vadd.f32 %v1373_v40, %v3515_v37  ;;  %v1294_v35 = vmul.f32 %v1904_v58, %v2943_v53  ;;  %1919 = vpow2.f32 %v1131_v5  ;;  %v3029_v51 = vpop.eup %1907  ;;  %v3519_v63 = vsub.f32 %v2646_v57, %v3518_v54  ;;  %v3525_v30 = vld [vmem:[#allocation62_spill] sm:$0xff] }
 0x205   : > { %1452 = vst [vmem:[%s3001_s28 + $0x88] sm:$0xff] %v1420_v47  ;;  %v1389_v28 = vmul.f32 %v3517_v21, %v1325_v48  ;;  %1921 = vrcp.f32 %v1184_v39  ;;  %v1200_v42 = vadd.f32 1.0, %v3020_v16  ;;  %v1107_v49 = vsub.f32 0.0, %v1075_v13  ;;  %v3037_v1 = vpop.eup %1909 }
 0x206   : > { %1437 = vst [vmem:[%s3001_s28 + $0x10] sm:$0xff] %v1405_v31  ;;  %v1374_v14 = vmul.f32 %v3519_v63, %v1310_v41  ;;  %v1326_v53 = vsel %vm1262_vm7, %v1904_v58, %v1294_v35  ;;  %v1185_v57 = vadd.f32 1.0, %v3029_v51  ;;  %v3044_v29 = vpop.eup %1911  ;;  %v3520_v36 = vsub.f32 %v2706_v44, %v2563_v24 }
 0x207   : > { %v1421_v10 = vadd.f32 %v1389_v28, %v2573_v26  ;;  %1923 = vrcp.f32 %v1200_v42  ;;  %v1201_v8 = vadd.f32 1.0, %v3037_v1  ;;  %v3051_v18 = vpop.eup %1913  ;;  %v1186_v26 = vadd.f32 1.0, %v3044_v29 }
 0x208   : > { %v1406_v2 = vadd.f32 %v1374_v14, %v3518_v54  ;;  %v1390_v17 = vmul.f32 %v3520_v36, %v1326_v53  ;;  %1925 = vrcp.f32 %v1185_v57  ;;  %v1163_v20 = vmul.f32 1.442695, %v1107_v49  ;;  %v3528_v14 = vld [vmem:[#allocation51_spill] sm:$0xff] }
 0x209   : > { %1453 = vst [vmem:[%s3001_s28 + $0x90] sm:$0xff] %v1421_v10  ;;  %v1060_v34 = vand.u32 2147483647, %v2966_v11  ;;  %1927 = vrcp.f32 %v1201_v8  ;;  %v1202_v44 = vadd.f32 1.0, %v3051_v18  ;;  %v1000_v6 = vsub.f32 %v3521_v45, %v2848_v38  ;;  %v3531_v53 = vld [vmem:[#allocation75_spill] sm:$0xff] }
 0x20a   : > { %1438 = vst [vmem:[%s3001_s28 + $0x18] sm:$0xff] %v1406_v2  ;;  %v1422_v19 = vadd.f32 %v1390_v17, %v2563_v24  ;;  %1929 = vrcp.f32 %v1186_v26  ;;  %v985_v37 = vsub.f32 %v3522_v0, %v2859_v9  ;;  %v1916_v25 = vpop.eup %1915  ;;  %vm1264_vm11 = vcmp.ge.f32.partialorder %v2857_v23, 0.0  ;;  %v3523_v24 = vld [vmem:[#allocation60_spill] sm:$0xff]  ;;  %v3538_v23 = vld [vmem:[#allocation33_spill] sm:$0xff] }
 0x20b   : > { %v1092_v22 = vsub.f32 0.0, %v1060_v34  ;;  %1931 = vrcp.f32 %v1202_v44  ;;  %v1001_v40 = vsub.f32 %v3523_v24, %v2868_v55  ;;  %v986_v47 = vsub.f32 %v3524_v56, %v2870_v62  ;;  %v1918_v58 = vpop.eup %1917  ;;  %v3533_v44 = vld [vmem:[#allocation19_spill] sm:$0xff] }
 0x20c   : > { %1454 = vst [vmem:[%s3001_s28 + $0x98] sm:$0xff] %v1422_v19  ;;  %v1002_v5 = vsub.f32 %v3525_v30, %v2891_v61  ;;  %v1279_v38 = vmul.f32 %v1916_v25, %v2975_v46  ;;  %vm1249_vm12 = vcmp.ge.f32.partialorder %v2864_v7, 0.0  ;;  %1933 = vpow2.f32 %v1163_v20  ;;  %v3532_v19 = vld [vmem:[#allocation32_spill] sm:$0xff] }
 0x20d   : > { %v1133_v9 = vmul.f32 1.442695, %v1092_v22  ;;  %v3075_v31 = vadd.f32 %v2763_v12, %v1000_v6  ;;  %v1295_v48 = vmul.f32 %v1918_v58, %v2983_v15  ;;  %vm1265_vm13 = vcmp.ge.f32.partialorder %v2906_v50, 0.0  ;;  %v3526_v15 = vld [vmem:[#allocation21_spill] sm:$0xff] }
 0x20e   : > { %v3080_v55 = vadd.f32 %v2761_v4, %v985_v37  ;;  %v3083_v62 = vadd.f32 %v2761_v4, %v1001_v40  ;;  %v3085_v39 = vpop.eup %1919  ;;  %v1311_v46 = vsel %vm1247_vm8, %v1916_v25, %v1279_v38  ;;  %vm1250_vm14 = vcmp.ge.f32.partialorder %v2927_v3, 0.0  ;;  %v3536_v38 = vld [vmem:[#allocation20_spill] sm:$0xff] }
 0x20f   : > { %1935 = vpow2.f32 %v1133_v9  ;;  %v1076_v13 = vand.u32 2147483647, %v3075_v31  ;;  %v1922_v21 = vpop.eup %1921  ;;  %v3527_v28 = vsub.f32 %v2650_v59, %v3526_v15  ;;  %v1327_v35 = vsel %vm1263_vm9, %v1918_v58, %v1295_v48  ;;  %v3535_v58 = vld [vmem:[#allocation52_spill] sm:$0xff] }
 0x210   : > { %v1187_v54 = vadd.f32 1.0, %v3085_v39  ;;  %v1061_v63 = vand.u32 2147483647, %v3080_v55  ;;  %v3530_v42 = vsub.f32 %v3528_v14, %v3529_v33  ;;  %v1280_v10 = vmul.f32 %v1922_v21, %v3009_v32 }
 0x211   : > { %v1375_v41 = vmul.f32 %v3527_v28, %v1311_v46  ;;  %vm1266_vm15 = vcmp.ge.f32.partialorder %v3531_v53, 0.0  ;;  %v1108_v57 = vsub.f32 0.0, %v1076_v13  ;;  %v1924_v2 = vpop.eup %1923  ;;  %v1077_v36 = vand.u32 2147483647, %v3083_v62  ;;  %v3539_v13 = vld [vmem:[#allocation25_spill] sm:$0xff] }
 0x212   : > { %v1391_v49 = vmul.f32 %v3530_v42, %v1327_v35  ;;  %1937 = vrcp.f32 %v1187_v54  ;;  %v1093_v60 = vsub.f32 0.0, %v1061_v63  ;;  %v1926_v17 = vpop.eup %1925  ;;  %v1312_v26 = vsel %vm1248_vm10, %v1922_v21, %v1280_v10  ;;  %v3542_v35 = vld [vmem:[#allocation26_spill] sm:$0xff]  ;;  %v3545_v42 = vld [vmem:[#allocation23_spill] sm:$0xff] }
 0x213   : > { %v1407_v59 = vadd.f32 %v1375_v41, %v3526_v15  ;;  %v1296_v20 = vmul.f32 %v1924_v2, %v3020_v16  ;;  %v1165_v32 = vmul.f32 1.442695, %v1108_v57  ;;  %v1928_v34 = vpop.eup %1927  ;;  %v3534_v22 = vsub.f32 %v3532_v19, %v3533_v44  ;;  %v3541_v41 = vld [vmem:[#allocation53_spill] sm:$0xff] }
 0x214   : > { %v1423_v8 = vadd.f32 %v1391_v49, %v3529_v33  ;;  %v1281_v6 = vmul.f32 %v1926_v17, %v3029_v51  ;;  %v1135_v0 = vmul.f32 1.442695, %v1093_v60  ;;  %v3115_v37 = vadd.f32 %v2763_v12, %v986_v47  ;;  %v1930_v25 = vpop.eup %1929  ;;  %v3548_v60 = vld [vmem:[#allocation24_spill] sm:$0xff] }
 0x215   : > { %1439 = vst [vmem:[%s3001_s28 + $0x20] sm:$0xff] %v1407_v59  ;;  %v1376_v45 = vmul.f32 %v3534_v22, %v1312_v26  ;;  %v1328_v43 = vsel %vm1264_vm11, %v1924_v2, %v1296_v20  ;;  %v1297_v16 = vmul.f32 %v1928_v34, %v3037_v1  ;;  %1939 = vpow2.f32 %v1165_v32  ;;  %v1932_v40 = vpop.eup %1931  ;;  %v3547_v59 = vld [vmem:[#allocation54_spill] sm:$0xff]  ;;  %v3550_v26 = vld [vmem:[#allocation28_spill] sm:$0xff]  ;;  %v3551_v20 = vld [vmem:[#allocation35_spill] sm:$0xff] }
 0x216   : > { %1455 = vst [vmem:[%s3001_s28 + $0xa0] sm:$0xff] %v1423_v8  ;;  %v1109_v24 = vsub.f32 0.0, %v1077_v36  ;;  %v3537_v51 = vsub.f32 %v3535_v58, %v3536_v38  ;;  %v1313_v47 = vsel %vm1249_vm12, %v1926_v17, %v1281_v6  ;;  %v1282_v48 = vmul.f32 %v1930_v25, %v3044_v29  ;;  %v3128_v46 = vpop.eup %1933  ;;  %v3553_v6 = vld [vmem:[#allocation44_spill] sm:$0xff]  ;;  %v3557_v58 = vld [vmem:[#allocation46_spill] sm:$0xff] }
 0x217   : > { %v1408_v56 = vadd.f32 %v1376_v45, %v3533_v44  ;;  %v3540_v1 = vsub.f32 %v3538_v23, %v3539_v13  ;;  %v1329_v15 = vsel %vm1265_vm13, %v1928_v34, %v1297_v16  ;;  %v1298_v28 = vmul.f32 %v1932_v40, %v3051_v18  ;;  %v3544_v18 = vld [vmem:[#allocation34_spill] sm:$0xff]  ;;  %v3552_v45 = vld [vmem:[#allocation71_spill] sm:$0xff]  ;;  %v3554_v16 = vld [vmem:[#allocation72_spill] sm:$0xff] }
 0x218   : > { %v1392_v9 = vmul.f32 %v3537_v51, %v1328_v43  ;;  %1941 = vpow2.f32 %v1135_v0  ;;  %v3543_v29 = vsub.f32 %v3541_v41, %v3542_v35  ;;  %v1314_v63 = vsel %vm1250_vm14, %v1930_v25, %v1282_v48  ;;  %v3559_v51 = vld [vmem:[#allocation66_spill] sm:$0xff]  ;;  %v3561_v41 = vld [vmem:[#allocation37_spill] sm:$0xff] }
 0x219   : > { %v1377_v21 = vmul.f32 %v3540_v1, %v1313_v47  ;;  %1440 = vst [vmem:[%s3001_s28 + $0x28] sm:$0xff] %v1408_v56  ;;  %v1203_v14 = vadd.f32 1.0, %v3128_v46  ;;  %v3144_v33 = vpop.eup %1935  ;;  %v3546_v49 = vsub.f32 %v3544_v18, %v3545_v42  ;;  %v1330_v57 = vsel %vm1266_vm15, %v1932_v40, %v1298_v28  ;;  %v3556_v56 = vld [vmem:[#allocation73_spill] sm:$0xff] }
 0x21a   : > { %v1424_v7 = vadd.f32 %v1392_v9, %v3536_v38  ;;  %v1393_v54 = vmul.f32 %v3543_v29, %v1329_v15  ;;  %v1167_v2 = vmul.f32 1.442695, %v1109_v24  ;;  %v3549_v36 = vsub.f32 %v3547_v59, %v3548_v60  ;;  %v3555_v24 = vld [vmem:[#allocation64_spill] sm:$0xff]  ;;  %v3562_v29 = vld [vmem:[#allocation29_spill] sm:$0xff] }
 0x21b   : > { %v1409_v50 = vadd.f32 %v1377_v21, %v3539_v13  ;;  %v1378_v10 = vmul.f32 %v3546_v49, %v1314_v63  ;;  %1943 = vrcp.f32 %v1203_v14  ;;  %v1188_v8 = vadd.f32 1.0, %v3144_v33  ;;  %v3564_v59 = vld [vmem:[#allocation36_spill] sm:$0xff] }
 0x21c   : > { %1456 = vst [vmem:[%s3001_s28 + $0xa8] sm:$0xff] %v1424_v7  ;;  %v1425_v3 = vadd.f32 %v1393_v54, %v3542_v35  ;;  %v1394_v17 = vmul.f32 %v3549_v36, %v1330_v57  ;;  %v1347_v32 = vsub.f32 %v3551_v20, %v3550_v26  ;;  %1945 = vpow2.f32 %v1167_v2  ;;  %v1938_v19 = vpop.eup %1937  ;;  %v3560_v7 = vld [vmem:[#allocation27_spill] sm:$0xff] }
 0x21d   : > { %1441 = vst [vmem:[%s3001_s28 + $0x30] sm:$0xff] %v1409_v50  ;;  %v1410_v53 = vadd.f32 %v1378_v10, %v3545_v42  ;;  %v1062_v34 = vand.u32 2147483647, %v3115_v37  ;;  %1947 = vrcp.f32 %v1188_v8  ;;  %v3169_v22 = vadd.f32 %v2763_v12, %v1002_v5  ;;  %v3558_v5 = vld [vmem:[#allocation74_spill] sm:$0xff]  ;;  %v3563_v54 = vld [vmem:[#allocation55_spill] sm:$0xff]  ;;  %v3567_v8 = vld [vmem:[#allocation68_spill] sm:$0xff] }
 0x21e   : > { %1457 = vst [vmem:[%s3001_s28 + $0xb0] sm:$0xff] %v1425_v3  ;;  %v1426_v44 = vadd.f32 %v1394_v17, %v3548_v60  ;;  %v987_v0 = vsub.f32 %v3553_v6, %v3552_v45  ;;  %v1283_v25 = vmul.f32 %v1938_v19, %v3085_v39  ;;  %v1003_v40 = vsub.f32 %v3555_v24, %v3554_v16  ;;  %v3565_v60 = vld [vmem:[#allocation48_spill] sm:$0xff] }
 0x21f   : > { %1442 = vst [vmem:[%s3001_s28 + $0x38] sm:$0xff] %v1410_v53  ;;  %v1094_v43 = vsub.f32 0.0, %v1062_v34  ;;  %v988_v38 = vsub.f32 %v3557_v58, %v3556_v56  ;;  %vm1251_vm0 = vcmp.ge.f32.partialorder %v2939_v52, 0.0  ;;  %v1078_v61 = vand.u32 2147483647, %v3169_v22  ;;  %v3187_v47 = vpop.eup %1939  ;;  %v3566_v17 = vld [vmem:[#allocation76_spill] sm:$0xff] }
 0x220   : > { %1458 = vst [vmem:[%s3001_s28 + $0xb8] sm:$0xff] %v1426_v44  ;;  %v3183_v30 = vadd.f32 %v2761_v4, %v987_v0  ;;  %v1004_v9 = vsub.f32 %v3559_v51, %v3558_v5  ;;  %v1315_v39 = vsel %vm1251_vm0, %v1938_v19, %v1283_v25  ;;  %v3190_v23 = vadd.f32 %v2761_v4, %v1003_v40  ;;  %v1995_v56 = vld [vmem:[%s2483_s15 + $0xc0] sm:$0xff]  ;;  %v3568_v51 = vld [vmem:[#allocation77_spill] sm:$0xff] }
 0x221   : > { %v1137_v48 = vmul.f32 1.442695, %v1094_v43  ;;  %v3193_v13 = vadd.f32 %v2763_v12, %v988_v38  ;;  %v1379_v1 = vmul.f32 %v1347_v32, %v1315_v39  ;;  %v1204_v52 = vadd.f32 1.0, %v3187_v47 }
 0x222   : > { %v1110_v21 = vsub.f32 0.0, %v1078_v61  ;;  %v1063_v15 = vand.u32 2147483647, %v3183_v30  ;;  %v3197_v28 = vpop.eup %1941  ;;  %v1348_v35 = vsub.f32 %v3561_v41, %v3560_v7  ;;  %v1363_v63 = vsub.f32 %v3563_v54, %v3562_v29  ;;  %v3572_v7 = vld [vmem:[#allocation39_spill] sm:$0xff] }
 0x223   : > { %1949 = vpow2.f32 %v1137_v48  ;;  %v1079_v14 = vand.u32 2147483647, %v3190_v23  ;;  %v1411_v50 = vadd.f32 %v1379_v1, %v3550_v26  ;;  %v1189_v18 = vadd.f32 1.0, %v3197_v28  ;;  %v3570_v48 = vld [vmem:[#allocation78_spill] sm:$0xff] }
 0x224   : > { %1951 = vrcp.f32 %v1204_v52  ;;  %v1169_v42 = vmul.f32 1.442695, %v1110_v21  ;;  %vm1267_vm1 = vcmp.ge.f32.partialorder %v2960_v27, 0.0  ;;  %v1095_v49 = vsub.f32 0.0, %v1063_v15  ;;  %v3571_v1 = vld [vmem:[#allocation70_spill] sm:$0xff] }
 0x225   : > { %v1111_v10 = vsub.f32 0.0, %v1079_v14  ;;  %v1064_v57 = vand.u32 2147483647, %v3193_v13  ;;  %v1944_v2 = vpop.eup %1943  ;;  %1443 = vst [vmem:[%s3001_s28 + $0x40] sm:$0xff] %v1411_v50  ;;  %1953 = vrcp.f32 %v1189_v18  ;;  %v3210_v3 = vadd.f32 %v2763_v12, %v1004_v9  ;;  %v3569_v9 = vld [vmem:[#allocation50_spill] sm:$0xff] }
 0x226   : > { %v989_v36 = vsub.f32 %v3565_v60, %v3564_v59  ;;  %v1005_v26 = vsub.f32 %v3567_v8, %v3566_v17  ;;  %v3216_v20 = vpop.eup %1945  ;;  %v1299_v32 = vmul.f32 %v1944_v2, %v3128_v46  ;;  %1955 = vpow2.f32 %v1169_v42  ;;  %v1996_v15 = vld [vmem:[%s2483_s15 + $0x50] sm:$0xff] }
 0x227   : > { %v1139_v53 = vmul.f32 1.442695, %v1095_v49  ;;  %v1171_v34 = vmul.f32 1.442695, %v1111_v10  ;;  %v1948_v19 = vpop.eup %1947  ;;  %vm1252_vm2 = vcmp.ge.f32.partialorder %v2966_v11, 0.0  ;;  %v1205_v44 = vadd.f32 1.0, %v3216_v20 }
 0x228   : > { %v1096_v45 = vsub.f32 0.0, %v1064_v57  ;;  %v1080_v6 = vand.u32 2147483647, %v3210_v3  ;;  %v1331_v0 = vsel %vm1267_vm1, %v1944_v2, %v1299_v32  ;;  %v1284_v25 = vmul.f32 %v1948_v19, %v3144_v33  ;;  %v3574_v32 = vld [vmem:[#allocation59_spill] sm:$0xff] }
 0x229   : > { %1957 = vpow2.f32 %v1139_v53  ;;  %v3226_v46 = vadd.f32 %v2761_v4, %v989_v36  ;;  %v1395_v43 = vmul.f32 %v1363_v63, %v1331_v0  ;;  %v3233_v5 = vadd.f32 %v2761_v4, %v1005_v26  ;;  %v1998_v63 = vld [vmem:[%s2483_s15 + $0xc8] sm:$0xff]  ;;  %v1999_v26 = vld [vmem:[%s2483_s15 + $0xd0] sm:$0xff] }
 0x22a   : > { %1959 = vrcp.f32 %v1205_v44  ;;  %v1141_v16 = vmul.f32 1.442695, %v1096_v45  ;;  %v1112_v24 = vsub.f32 0.0, %v1080_v6  ;;  %v1316_v11 = vsel %vm1252_vm2, %v1948_v19, %v1284_v25  ;;  %v3573_v4 = vld [vmem:[#allocation57_spill] sm:$0xff] }
 0x22b   : > { %1961 = vpow2.f32 %v1171_v34  ;;  %v1065_v40 = vand.u32 2147483647, %v3226_v46  ;;  %v1427_v27 = vadd.f32 %v1995_v56, %v1395_v43  ;;  %v1380_v58 = vmul.f32 %v1348_v35, %v1316_v11  ;;  %v1997_v35 = vld [vmem:[%s2483_s15 + $0x48] sm:$0xff] }
 0x22c   : > { %1963 = vpow2.f32 %v1141_v16  ;;  %v1173_v33 = vmul.f32 1.442695, %v1112_v24  ;;  %v990_v39 = vsub.f32 %v3569_v9, %v3568_v51  ;;  %v1006_v52 = vsub.f32 %v3571_v1, %v3570_v48  ;;  %v2000_v48 = vld [vmem:[%s2483_s15 + $0x58] sm:$0xff]  ;;  %v3575_v1 = vld [vmem:[#allocation41_spill] sm:$0xff] }
 0x22d   : > { %v3230_v38 = vpop.eup %1949  ;;  %v1097_v61 = vsub.f32 0.0, %v1065_v40  ;;  %v1349_v41 = vsub.f32 %v3572_v7, %v1996_v15  ;;  %1459 = vst [vmem:[%s3001_s28 + $0xc0] sm:$0xff] %v1427_v27  ;;  %v1412_v29 = vadd.f32 %v1997_v35, %v1380_v58  ;;  %v1364_v14 = vsub.f32 %v3573_v4, %v1998_v63 }
 0x22e   : > { %v1952_v21 = vpop.eup %1951  ;;  %v1190_v54 = vadd.f32 1.0, %v3230_v38  ;;  %1965 = vpow2.f32 %v1173_v33  ;;  %v1081_v42 = vand.u32 2147483647, %v3233_v5  ;;  %vm1268_vm3 = vcmp.ge.f32.partialorder %v3075_v31, 0.0 }
 0x22f   : > { %v1300_v50 = vmul.f32 %v1952_v21, %v3187_v47  ;;  %v1143_v18 = vmul.f32 1.442695, %v1097_v61  ;;  %v1954_v49 = vpop.eup %1953  ;;  %1444 = vst [vmem:[%s3001_s28 + $0x48] sm:$0xff] %v1412_v29  ;;  %v3251_v10 = vadd.f32 %v2763_v12, %v990_v39  ;;  %v3254_v57 = vadd.f32 %v2763_v12, %v1006_v52 }
 0x230   : > { %1967 = vrcp.f32 %v1190_v54  ;;  %v1956_v2 = vpop.eup %1955  ;;  %v1285_v60 = vmul.f32 %v1954_v49, %v3197_v28  ;;  %v1113_v47 = vsub.f32 0.0, %v1081_v42  ;;  %vm1253_vm4 = vcmp.ge.f32.partialorder %v3080_v55, 0.0  ;;  %v2001_v54 = vld [vmem:[%s2483_s15 + $0xd8] sm:$0xff] }
 0x231   : > { %v1332_v59 = vsel %vm1268_vm3, %v1952_v21, %v1300_v50  ;;  %1969 = vpow2.f32 %v1143_v18  ;;  %v1206_v17 = vadd.f32 1.0, %v1956_v2  ;;  %v1066_v8 = vand.u32 2147483647, %v3251_v10 }
 0x232   : > { %v1396_v36 = vmul.f32 %v1364_v14, %v1332_v59  ;;  %v1365_v53 = vsub.f32 %v3574_v32, %v1999_v26  ;;  %v1317_v34 = vsel %vm1253_vm4, %v1954_v49, %v1285_v60  ;;  %v1175_v12 = vmul.f32 1.442695, %v1113_v47  ;;  %v2002_v49 = vld [vmem:[%s2483_s15 + $0x60] sm:$0xff]  ;;  %v3577_v59 = vld [vmem:[#allocation43_spill] sm:$0xff] }
 0x233   : > { %v1958_v31 = vpop.eup %1957  ;;  %v1082_v19 = vand.u32 2147483647, %v3254_v57  ;;  %v1381_v28 = vmul.f32 %v1349_v41, %v1317_v34  ;;  %1971 = vrcp.f32 %v1206_v17  ;;  %v1098_v25 = vsub.f32 0.0, %v1066_v8  ;;  %v3578_v17 = vld [vmem:[#allocation45_spill] sm:$0xff] }
 0x234   : > { %v1960_v44 = vpop.eup %1959  ;;  %v1428_v45 = vadd.f32 %v1998_v63, %v1396_v36  ;;  %v1191_v6 = vadd.f32 1.0, %v1958_v31  ;;  %1973 = vpow2.f32 %v1175_v12  ;;  %vm1269_vm5 = vcmp.ge.f32.partialorder %v3083_v62, 0.0  ;;  %v3576_v63 = vld [vmem:[#allocation61_spill] sm:$0xff] }
 0x235   : > { %v1962_v0 = vpop.eup %1961  ;;  %v1301_v55 = vmul.f32 %v1960_v44, %v3216_v20  ;;  %v1114_v43 = vsub.f32 0.0, %v1082_v19  ;;  %v1413_v24 = vadd.f32 %v1996_v15, %v1381_v28  ;;  %v1145_v27 = vmul.f32 1.442695, %v1098_v25  ;;  %v2003_v36 = vld [vmem:[%s2483_s15 + $0x68] sm:$0xff] }
 0x236   : > { %v1964_v16 = vpop.eup %1963  ;;  %1460 = vst [vmem:[%s3001_s28 + $0xc8] sm:$0xff] %v1428_v45  ;;  %1975 = vrcp.f32 %v1191_v6  ;;  %v1207_v11 = vadd.f32 1.0, %v1962_v0  ;;  %v1350_v52 = vsub.f32 %v3575_v1, %v2000_v48  ;;  %vm1254_vm6 = vcmp.ge.f32.partialorder %v3115_v37, 0.0  ;;  %v2005_v28 = vld [vmem:[%s2483_s15 + $0xe8] sm:$0xff] }
 0x237   : > { %v1333_v40 = vsel %vm1269_vm5, %v1960_v44, %v1301_v55  ;;  %v1192_v56 = vadd.f32 1.0, %v1964_v16  ;;  %1445 = vst [vmem:[%s3001_s28 + $0x50] sm:$0xff] %v1413_v24  ;;  %v1177_v20 = vmul.f32 1.442695, %v1114_v43  ;;  %v1366_v4 = vsub.f32 %v3576_v63, %v2001_v54 }
 0x238   : > { %v3265_v58 = vpop.eup %1965  ;;  %v1397_v33 = vmul.f32 %v1365_v53, %v1333_v40  ;;  %1977 = vrcp.f32 %v1207_v11  ;;  %vm1270_vm7 = vcmp.ge.f32.partialorder %v3169_v22, 0.0  ;;  %v1351_v60 = vsub.f32 %v3577_v59, %v2002_v49  ;;  %v3579_v22 = vld [vmem:[#allocation63_spill] sm:$0xff] }
 0x239   : > { %1979 = vrcp.f32 %v1192_v56  ;;  %v1208_v61 = vadd.f32 1.0, %v3265_v58  ;;  %vm1255_vm8 = vcmp.ge.f32.partialorder %v3183_v30, 0.0  ;;  %v1352_v8 = vsub.f32 %v3578_v17, %v2003_v36  ;;  %v3580_v30 = vld [vmem:[#allocation65_spill] sm:$0xff] }
 0x23a   : > { %v1968_v51 = vpop.eup %1967  ;;  %v1429_v9 = vadd.f32 %v1999_v26, %v1397_v33  ;;  %1981 = vpow2.f32 %v1145_v27  ;;  %v2004_v26 = vld [vmem:[%s2483_s15 + $0xe0] sm:$0xff]  ;;  %vm1271_vm9 = vcmp.ge.f32.partialorder %v3190_v23, 0.0  ;;  %v1368_v6 = vsub.f32 %v3580_v30, %v2005_v28 }
 0x23b   : > { %v3269_v62 = vpop.eup %1969  ;;  %v1286_v39 = vmul.f32 %v1968_v51, %v3230_v38  ;;  %1983 = vrcp.f32 %v1208_v61  ;;  %v1367_v32 = vsub.f32 %v3579_v22, %v2004_v26  ;;  %vm1256_vm10 = vcmp.ge.f32.partialorder %v3193_v13, 0.0 }
 0x23c   : > { %1461 = vst [vmem:[%s3001_s28 + $0xd0] sm:$0xff] %v1429_v9  ;;  %v1193_v21 = vadd.f32 1.0, %v3269_v62  ;;  %1985 = vpow2.f32 %v1177_v20  ;;  %vm1272_vm11 = vcmp.ge.f32.partialorder %v3210_v3, 0.0  ;;  %v3581_v9 = vld [vmem:[#allocation47_spill] sm:$0xff]  ;;  %vm1257_vm12 = vcmp.ge.f32.partialorder %v3226_v46, 0.0 }
 0x23d   : > { %v1318_v15 = vsel %vm1254_vm6, %v1968_v51, %v1286_v39  ;;  %v1972_v7 = vpop.eup %1971  ;;  %v2006_v51 = vld [vmem:[%s2483_s15 + $0x70] sm:$0xff]  ;;  %vm1273_vm13 = vcmp.ge.f32.partialorder %v3233_v5, 0.0  ;;  %vm1258_vm14 = vcmp.ge.f32.partialorder %v3251_v10, 0.0  ;;  %vm1274_vm15 = vcmp.ge.f32.partialorder %v3254_v57, 0.0 }
 0x23e   : > { %v1382_v41 = vmul.f32 %v1350_v52, %v1318_v15  ;;  %1987 = vrcp.f32 %v1193_v21  ;;  %v3277_v35 = vpop.eup %1973  ;;  %v1302_v29 = vmul.f32 %v1972_v7, %v1956_v2  ;;  %v2007_v21 = vld [vmem:[%s2483_s15 + $0xf0] sm:$0xff] }
 0x23f   : > { %v1209_v37 = vadd.f32 1.0, %v3277_v35 }
 0x240   : > { %v1976_v38 = vpop.eup %1975  ;;  %v1414_v14 = vadd.f32 %v2000_v48, %v1382_v41  ;;  %v1334_v50 = vsel %vm1270_vm7, %v1972_v7, %v1302_v29 }
 0x241   : > { %v1287_v18 = vmul.f32 %v1976_v38, %v1958_v31  ;;  %v1398_v47 = vmul.f32 %v1366_v4, %v1334_v50  ;;  %1989 = vrcp.f32 %v1209_v37  ;;  %v2008_v4 = vld [vmem:[%s2483_s15 + $0x78] sm:$0xff] }
 0x242   : > { %v1978_v42 = vpop.eup %1977  ;;  %1446 = vst [vmem:[%s3001_s28 + $0x58] sm:$0xff] %v1414_v14  ;;  %v3583_v14 = vld [vmem:[#allocation49_spill] sm:$0xff]  ;;  %v2009_v50 = vld [vmem:[%s2483_s15 + $0xf8] sm:$0xff] }
 0x243   : > { %v1980_v2 = vpop.eup %1979  ;;  %v1319_v53 = vsel %vm1255_vm8, %v1976_v38, %v1287_v18  ;;  %v1303_v31 = vmul.f32 %v1978_v42, %v1962_v0  ;;  %v1430_v12 = vadd.f32 %v2001_v54, %v1398_v47  ;;  %v1354_v37 = vsub.f32 %v3583_v14, %v2008_v4  ;;  %v3584_v18 = vld [vmem:[#allocation69_spill] sm:$0xff] }
 0x244   : > { %v1982_v34 = vpop.eup %1981  ;;  %v1383_v19 = vmul.f32 %v1351_v60, %v1319_v53  ;;  %v1288_v44 = vmul.f32 %v1980_v2, %v1964_v16 }
 0x245   : > { %v1984_v45 = vpop.eup %1983  ;;  %v1335_v55 = vsel %vm1271_vm9, %v1978_v42, %v1303_v31  ;;  %v1194_v25 = vadd.f32 1.0, %v1982_v34  ;;  %1462 = vst [vmem:[%s3001_s28 + $0xd8] sm:$0xff] %v1430_v12  ;;  %v1370_v42 = vsub.f32 %v3584_v18, %v2009_v50 }
 0x246   : > { %v1986_v43 = vpop.eup %1985  ;;  %v1415_v24 = vadd.f32 %v2002_v49, %v1383_v19  ;;  %v1399_v0 = vmul.f32 %v1367_v32, %v1335_v55  ;;  %v1320_v11 = vsel %vm1256_vm10, %v1980_v2, %v1288_v44  ;;  %v1304_v40 = vmul.f32 %v1984_v45, %v3265_v58 }
 0x247   : > { %v1384_v23 = vmul.f32 %v1352_v8, %v1320_v11  ;;  %1991 = vrcp.f32 %v1194_v25  ;;  %v1210_v16 = vadd.f32 1.0, %v1986_v43  ;;  %v1353_v58 = vsub.f32 %v3581_v9, %v2006_v51 }
 0x248   : > { %v1988_v56 = vpop.eup %1987  ;;  %1447 = vst [vmem:[%s3001_s28 + $0x60] sm:$0xff] %v1415_v24  ;;  %v1431_v13 = vadd.f32 %v2004_v26, %v1399_v0  ;;  %v1336_v27 = vsel %vm1272_vm11, %v1984_v45, %v1304_v40 }
 0x249   : > { %v1416_v33 = vadd.f32 %v2003_v36, %v1384_v23  ;;  %v1400_v20 = vmul.f32 %v1368_v6, %v1336_v27  ;;  %v1289_v61 = vmul.f32 %v1988_v56, %v3269_v62  ;;  %1993 = vrcp.f32 %v1210_v16  ;;  %v3582_v62 = vld [vmem:[#allocation67_spill] sm:$0xff] }
 0x24a   : > { %1463 = vst [vmem:[%s3001_s28 + $0xe0] sm:$0xff] %v1431_v13  ;;  %v1369_v15 = vsub.f32 %v3582_v62, %v2007_v21 }
 0x24b   : > { %1448 = vst [vmem:[%s3001_s28 + $0x68] sm:$0xff] %v1416_v33  ;;  %v1432_v3 = vadd.f32 %v2005_v28, %v1400_v20  ;;  %v1321_v39 = vsel %vm1257_vm12, %v1988_v56, %v1289_v61  ;;  %v1990_v48 = vpop.eup %1989 }
 0x24c   : > { %v1385_v1 = vmul.f32 %v1353_v58, %v1321_v39  ;;  %v1305_v52 = vmul.f32 %v1990_v48, %v3277_v35 }
 0x24d   : > { %1464 = vst [vmem:[%s3001_s28 + $0xe8] sm:$0xff] %v1432_v3 }
 0x24e   : > { %v1417_v7 = vadd.f32 %v2006_v51, %v1385_v1  ;;  %v1337_v41 = vsel %vm1273_vm13, %v1990_v48, %v1305_v52 }
 0x24f   : > { %v1401_v46 = vmul.f32 %v1369_v15, %v1337_v41 }
 0x250   : > { %1449 = vst [vmem:[%s3001_s28 + $0x70] sm:$0xff] %v1417_v7 }
 0x251   : > { %v1992_v29 = vpop.eup %1991  ;;  %v1433_v38 = vadd.f32 %v2007_v21, %v1401_v46 }
 0x252   : > { %v1290_v54 = vmul.f32 %v1992_v29, %v1982_v34 }
 0x253   : > { %v1994_v63 = vpop.eup %1993  ;;  %1465 = vst [vmem:[%s3001_s28 + $0xf0] sm:$0xff] %v1433_v38 }
 0x254   : > { %v1322_v35 = vsel %vm1258_vm14, %v1992_v29, %v1290_v54  ;;  %v1306_v5 = vmul.f32 %v1994_v63, %v1986_v43 }
 0x255   : > { %v1386_v49 = vmul.f32 %v1354_v37, %v1322_v35 }
 0x256   : > { %v1338_v59 = vsel %vm1274_vm15, %v1994_v63, %v1306_v5 }
 0x257   : > { %v1418_v60 = vadd.f32 %v2008_v4, %v1386_v49  ;;  %v1402_v47 = vmul.f32 %v1370_v42, %v1338_v59 }
 0x259   : > { %1450 = vst [vmem:[%s3001_s28 + $0x78] sm:$0xff] %v1418_v60  ;;  %v1434_v10 = vadd.f32 %v2009_v50, %v1402_v47 }
 0x25b   : > { %1466 = vst [vmem:[%s3001_s28 + $0xf8] sm:$0xff] %v1434_v10 }
 0x25c   : > { %2139 = shalt.err (!%p2136_p5)
}
 0x25d   : > { %s2140_s30 = scalar_lea.hbm %s3323_s8, 4096  ;;  %s2144_s26 = scalar_lea.hbm %s3376_s5, 8192 }
 0x25e   : > { %p2141_p9 = scmp.ne.s32.totalorder %s3323_s8, %s2140_s30  ;;  %p2145_p11 = scmp.lt.u32.totalorder %s3323_s8, %s3376_s5 }
 0x25f   : > { %p2146_p1 = scmp.lt.u32.totalorder %s2144_s26, %s2140_s30  ;;  %p2148_p2 = scmp.lt.u32.totalorder %s2140_s30, %s3323_s8 }
 0x260   : > { %p2142_p0 = pnand %p2141_p9, %p3585_p13 }
 0x261   : > { %p2147_p12 = por %p2146_p1, %p2145_p11 }
 0x262   : > { %p2143_p8 = pneg %p2142_p0 }
 0x263   : > { %p2149_p6 = por %p2148_p2, %p2147_p12 }
 0x265   : > { %p2150_p10 = pnand %p2149_p6, %p2143_p8 }
 0x267   : > { %2153 = shalt.err (!%p2150_p10)
}
 0x268   : > { %s2218_s24 = smov 256   ;;  %s2219_s9 = smov 16  }
 0x269   : > { %1798 = dma.vmem_to_hbm [thread:$0]  (%p3585_p13), %s3325_s23, 4096, %s3323_s8, %s1468_s11, %s2218_s24, %s2218_s24, %s2219_s9  }
 0x26a PF: > { %s1497_s28 = sand.u32 1, %s2192_s18   ;;  %p3586_p4 = scmp.ne.s32.totalorder %s3424_s25, 0 }
 0x26b   : > { %p3587_p7 = scmp.ge.s32.totalorder %s2204_s21, 2  ;;  %s1498_s17 = scalar_lea.sflag [#allocation4], %s1497_s28 }
 0x26d   : > { %p1815_p3 = pnand %p3587_p7, %p3586_p4 }
 0x26f   : > { %2187 = dma.done.wait (!%p1815_p3), %s1498_s17, 4096  }
 0x270   : > { %2189 = vsyncadd (!%p1815_p3), %s1498_s17, 4294963200  ;;  %p22_p5 = scmp.ge.s32.totalorder %s2363_s16, 4   ;;  %s3588_s18 = smov %s2196_s19 }
 0x271   : > { %s3589_s19 = smov %s2200_s20  ;;  %s3590_s20 = smov %s2372_s27 }
 0x272   : > { %s3591_s21 = smov %s2363_s16  ;;  %24 = sbr.rel (!%p22_p5) target bundleno = 12 (0xc), region = 106 }
 0x279   :  { %1503 = vsyncpa [#allocation3], 1 }
 0x27a   :  { %1505 = vsyncpa [#allocation3 + $0x1], 1 }
 0x27b   :  { %1506 = vsyncpa [#allocation6], 1 }
 0x27c   :  { %1508 = vsyncpa [#allocation6 + $0x1], 1 }
 0x27d   :  { %1509 = vsyncpa [#allocation9], 1 }
 0x27e   :  { %1510 = vsyncpa [#allocation4], 1 }
 0x27f   :  { %1512 = vsyncpa [#allocation4 + $0x1], 1 }

</bundles_post_ra>
